<compile_context>
chip_gen: v6e
topology: v6e:2x2x1
jax: 0.10.0
libtpu: 0.0.40
codegen_flags: <defaults>
</compile_context>

<pallas_src>
import functools
import math

import jax
import jax.numpy as jnp
from jax.experimental import pallas as pl
from jax.experimental.pallas import tpu as pltpu


def _time2vec_kernel(x_ref, w_ref, b_ref, out_ref, *, linear_channel, group):
    # x_ref  : (TN, PACK*C)        streamed packed-row tile (lane-dense)
    # w_ref  : (PACK*C, PACK*G)    resident block-diagonal fused weights
    # b_ref  : (1, PACK*G)         resident tiled fused bias (f32)
    # out_ref: (TN, PACK*G)        packed output tile (lane-dense)
    x = x_ref[...]
    # Single fused MXU matmul, f32 accumulation.
    y = jnp.dot(x, w_ref[...], preferred_element_type=jnp.float32) + b_ref[...]
    # Periodic columns are those with (lane % group) >= linear_channel in the
    # packed layout.  sin is multi-op VPU work; it is applied to all lanes and
    # selected because the periodic lanes are strided (see header note).
    col = jax.lax.broadcasted_iota(jnp.int32, y.shape, dimension=1)
    is_per = (col % group) >= linear_channel
    y = jnp.where(is_per, jnp.sin(y), y)
    out_ref[...] = y.astype(out_ref.dtype)


def time2vec(x, w_lin, b_lin, w_per, b_per, *, block_rows=32768):
    """Time2Vec forward: concat(linear_fc(x), sin(period_fc(x))) on the last dim.

    x      : (..., C)
    w_lin  : (L, C), b_lin : (L,)   (PyTorch nn.Linear weight layout)
    w_per  : (P, C), b_per : (P,)
    returns: (..., L + P), same dtype as x.
    """
    C = x.shape[-1]
    L, P = w_lin.shape[0], w_per.shape[0]
    G = L + P
    lead = x.shape[:-1]
    n_rows = math.prod(lead) if lead else 1

    # Packing factor: PACK logical rows per packed row, chosen so the packed
    # input lane width PACK*C is a multiple of 128 (lane-dense DMA / stores).
    pack = 128 // math.gcd(128, C)
    in_w = pack * C          # 128 for C=4
    out_w = pack * G         # 1024 for L+P=32

    # Pad row count to a multiple of PACK so the reshapes are free/row-major.
    n_pad = (-n_rows) % pack
    x2 = x.reshape(n_rows, C)
    if n_pad:
        x2 = jnp.pad(x2, ((0, n_pad), (0, 0)))
    n_rows_p = n_rows + n_pad
    n_packed = n_rows_p // pack
    x_packed = x2.reshape(n_packed, in_w)        # free row-major reshape

    # Fuse the two nn.Linear projections, then block-diagonalize over PACK:
    #   W_bd[C*r + c, G*r + o] = w_cat[c, o]
    w_cat = jnp.concatenate([w_lin.T, w_per.T], axis=1)              # (C, G)
    eye = jnp.eye(pack, dtype=w_cat.dtype)
    w_bd = (eye[:, None, :, None] * w_cat[None, :, None, :]) \
        .reshape(in_w, out_w).astype(x.dtype)
    b_cat = jnp.concatenate([b_lin, b_per]).astype(jnp.float32)      # (G,)
    b_bd = jnp.tile(b_cat, pack).reshape(1, out_w)                   # (1, PACK*G)

    # Packed-row tile: big enough to amortize the per-step pipeline overhead,
    # rounded to a multiple of 8 (sublane) unless it covers the whole array.
    block_packed = max(1, block_rows // pack)
    tn = min(block_packed, n_packed)
    if n_packed >= 8:
        tn = max(8, (tn // 8) * 8)
    grid = (pl.cdiv(n_packed, tn),)

    kernel = functools.partial(_time2vec_kernel, linear_channel=L, group=G)

    out_packed = pl.pallas_call(
        kernel,
        out_shape=jax.ShapeDtypeStruct((n_packed, out_w), x.dtype),
        grid=grid,
        in_specs=[
            pl.BlockSpec((tn, in_w), lambda i: (i, 0)),       # streamed packed rows
            pl.BlockSpec((in_w, out_w), lambda i: (0, 0)),    # resident weights
            pl.BlockSpec((1, out_w), lambda i: (0, 0)),       # resident bias
        ],
        out_specs=pl.BlockSpec((tn, out_w), lambda i: (i, 0)),
        compiler_params=pltpu.CompilerParams(
            dimension_semantics=("parallel",),                # shard rows over TCs (v7x)
            vmem_limit_bytes=32 * 1024 * 1024,                # ~10 MiB working set; safe on all gens
        ),
    )(x_packed, w_bd, b_bd)

    out = out_packed.reshape(n_rows_p, G)                     # free row-major reshape
    if n_pad:
        out = out[:n_rows]
    return out.reshape(*lead, G)


if __name__ == "__main__":
    # Small, deterministic setup consistent with the module:
    # input_channel=4, linear_channel=16, period_channel=16, batch=2, seq=8.
    key = jax.random.PRNGKey(0)
    k_x, k_wl, k_bl, k_wp, k_bp = jax.random.split(key, 5)

    batch, seq, C = 2, 8, 4
    L, P = 16, 16

    x = jax.random.normal(k_x, (batch, seq, C), dtype=jnp.float32)
    # Deterministic synthetic parameters (PyTorch nn.Linear shapes).
    w_lin = jax.random.normal(k_wl, (L, C), dtype=jnp.float32) * 0.1
    b_lin = jax.random.normal(k_bl, (L,), dtype=jnp.float32) * 0.1
    w_per = jax.random.normal(k_wp, (P, C), dtype=jnp.float32) * 0.1
    b_per = jax.random.normal(k_bp, (P,), dtype=jnp.float32) * 0.1

    out = jax.block_until_ready(time2vec(x, w_lin, b_lin, w_per, b_per))

    # Reference (pure JAX, same math as the PyTorch forward).
    lin_ref = x @ w_lin.T + b_lin
    per_ref = jnp.sin(x @ w_per.T + b_per)
    ref = jnp.concatenate([lin_ref, per_ref], axis=-1)
    assert out.shape == (batch, seq, L + P)
    assert jnp.allclose(out, ref, atol=1e-5, rtol=1e-5)

    # Second check: exercises (a) row padding to the packing factor
    # (400 rows -> pad to 416 = 13 packed rows), (b) a multi-step grid with a
    # partial trailing packed-row tile (block_rows=128 -> 8-packed-row tiles
    # -> 2 grid steps, last one partial).
    batch2, seq2 = 4, 100
    x_big = jax.random.normal(k_x, (batch2, seq2, C), dtype=jnp.float32)
    out_big = jax.block_until_ready(
        time2vec(x_big, w_lin, b_lin, w_per, b_per, block_rows=128)
    )
    ref_big = jnp.concatenate(
        [x_big @ w_lin.T + b_lin, jnp.sin(x_big @ w_per.T + b_per)], axis=-1
    )
    assert out_big.shape == (batch2, seq2, L + P)
    assert jnp.allclose(out_big, ref_big, atol=1e-5, rtol=1e-5)

    print("KERNEL_OK")
</pallas_src>

<mosaic_0001>
module attributes {stable_mosaic.version = 11 : i64} {
  func.func @_time2vec_kernel(%arg0: i32, %arg1: memref<1x128xf32, #tpu.memory_space<vmem>>, %arg2: memref<128x1024xf32, #tpu.memory_space<vmem>>, %arg3: memref<1x1024xf32, #tpu.memory_space<vmem>>, %arg4: memref<1x1024xf32, #tpu.memory_space<vmem>>) attributes {dimension_semantics = [#tpu.dimension_semantics<parallel>], iteration_bounds = array<i64: 1>, scalar_prefetch = 0 : i64, scratch_operands = 0 : i64, tpu.core_type = #tpu.core_type<tc>, window_params = [{transform_indices = @transform_0, window_bounds = array<i64: 1, 128>}, {pipeline_mode = #tpu.pipeline_mode<synchronous>, transform_indices = @transform_1, window_bounds = array<i64: 128, 1024>}, {pipeline_mode = #tpu.pipeline_mode<synchronous>, transform_indices = @transform_2, window_bounds = array<i64: 1, 1024>}, {transform_indices = @transform_3, window_bounds = array<i64: 1, 1024>}]} {
    %c0 = arith.constant 0 : index
    %c0_0 = arith.constant 0 : index
    %0 = vector.load %arg1[%c0, %c0_0] : memref<1x128xf32, #tpu.memory_space<vmem>>, vector<1x128xf32>
    %c0_1 = arith.constant 0 : index
    %c0_2 = arith.constant 0 : index
    %1 = vector.load %arg2[%c0_1, %c0_2] : memref<128x1024xf32, #tpu.memory_space<vmem>>, vector<128x1024xf32>
    %cst = arith.constant dense<0.000000e+00> : vector<1x1024xf32>
    %2 = tpu.matmul %0, %1, %cst {dimension_numbers = #tpu.dot_dimension_numbers<[1], [0], [0], [1], [0, 0, 1, 1], [], []>} : vector<1x128xf32>, vector<128x1024xf32>, vector<1x1024xf32> -> vector<1x1024xf32>
    %c0_3 = arith.constant 0 : index
    %c0_4 = arith.constant 0 : index
    %3 = vector.load %arg3[%c0_3, %c0_4] : memref<1x1024xf32, #tpu.memory_space<vmem>>, vector<1x1024xf32>
    %4 = arith.addf %2, %3 : vector<1x1024xf32>
    %5 = tpu.iota {dimensions = array<i32: 1>} : vector<1x1024xi32>
    %c32_i32 = arith.constant 32 : i32
    %c0_i32 = arith.constant 0 : i32
    %6 = arith.cmpi eq, %c32_i32, %c0_i32 : i32
    %c1_i32 = arith.constant 1 : i32
    %7 = arith.select %6, %c1_i32, %c32_i32 : i32
    %8 = vector.broadcast %7 : i32 to vector<1x1024xi32>
    %9 = arith.remsi %5, %8 : vector<1x1024xi32>
    %c0_i32_5 = arith.constant 0 : i32
    %10 = vector.broadcast %c0_i32_5 : i32 to vector<1x1024xi32>
    %11 = arith.cmpi ne, %9, %10 : vector<1x1024xi32>
    %c0_i32_6 = arith.constant 0 : i32
    %12 = vector.broadcast %c0_i32_6 : i32 to vector<1x1024xi32>
    %13 = arith.cmpi slt, %9, %12 : vector<1x1024xi32>
    %c0_i32_7 = arith.constant 0 : i32
    %14 = arith.cmpi slt, %7, %c0_i32_7 : i32
    %15 = vector.broadcast %14 : i1 to vector<1x1024xi1>
    %16 = vector.broadcast %15 : vector<1x1024xi1> to vector<1x1024xi1>
    %17 = arith.xori %13, %16 : vector<1x1024xi1>
    %18 = arith.andi %17, %11 : vector<1x1024xi1>
    %19 = vector.broadcast %7 : i32 to vector<1x1024xi32>
    %20 = arith.addi %9, %19 : vector<1x1024xi32>
    %21 = arith.select %18, %20, %9 : vector<1x1024xi1>, vector<1x1024xi32>
    %c16_i32 = arith.constant 16 : i32
    %22 = vector.broadcast %c16_i32 : i32 to vector<1x1024xi32>
    %23 = arith.cmpi sge, %21, %22 : vector<1x1024xi32>
    %24 = math.sin %4 : vector<1x1024xf32>
    %25 = arith.select %23, %24, %4 : vector<1x1024xi1>, vector<1x1024xf32>
    %c0_8 = arith.constant 0 : index
    %c0_9 = arith.constant 0 : index
    %26 = vector.load %arg4[%c0_8, %c0_9] : memref<1x1024xf32, #tpu.memory_space<vmem>>, vector<1x1024xf32>
    tpu.vector_store %arg4[%c0_8, %c0_9], %25 {strides = array<i32>} : memref<1x1024xf32, #tpu.memory_space<vmem>>, vector<1x1024xf32>,
    return
  }
  func.func @transform_0(%arg0: i32) -> (i32, i32) {
    %c0_i32 = arith.constant 0 : i32
    %c0_i32_0 = arith.constant 0 : i32
    return %arg0, %c0_i32 : i32, i32
  }
  func.func @transform_1(%arg0: i32) -> (i32, i32) {
    %c0_i32 = arith.constant 0 : i32
    %c0_i32_0 = arith.constant 0 : i32
    %c0_i32_1 = arith.constant 0 : i32
    return %c0_i32, %c0_i32_0 : i32, i32
  }
  func.func @transform_2(%arg0: i32) -> (i32, i32) {
    %c0_i32 = arith.constant 0 : i32
    %c0_i32_0 = arith.constant 0 : i32
    %c0_i32_1 = arith.constant 0 : i32
    return %c0_i32, %c0_i32_0 : i32, i32
  }
  func.func @transform_3(%arg0: i32) -> (i32, i32) {
    %c0_i32 = arith.constant 0 : i32
    %c0_i32_0 = arith.constant 0 : i32
    return %arg0, %c0_i32 : i32, i32
  }
}

</mosaic_0001>

<bundles_post_ra>
// kernel: tpu_custom_call.1
= control target key start
LH: loop header
LB: loop body
LE: loop exit
PB: predicated region body
PF: predicated region fallthrough
CT: control target
= control target key end

     0   :  { %8 = vsyncpa [#allocation3], 0  ;;  %s2698_s0 = inlined_call_operand.hbm [shape: f32[1,128], index: 0, kind: input, shape index: {}]   ;;  %s2699_s1 = inlined_call_operand.hbm [shape: f32[128,1024], index: 1, kind: input, shape index: {}]   ;;  %s2700_s2 = inlined_call_operand.hbm [shape: f32[1,1024], index: 2, kind: input, shape index: {}]   ;;  %s2701_s3 = inlined_call_operand.hbm [shape: f32[1,1024], index: 3, kind: output, shape index: {}]  }
   0x1   :  { %9 = vsyncpa [#allocation6], 0 }
   0x2   :  { %10 = vsyncpa [#allocation4], 0  ;;  %s1731_s12 = smov [#allocation5]  }
   0x3   :  { %s26_s13 = sshll.u32 %s1731_s12, 4  ;;  %s27_s13 = int_to_ptr.vmem [resolvable:$true] %s26_s13 }
   0x4   :  { %s1653_s14 = scalar_lea.vmem %s27_s13, 16384  ;;  %p1658_p1 = scmp.lt.s32.totalorder %s27_s13, %s27_s13 }
   0x5   :  { %p1654_p0 = scmp.ne.s32.totalorder %s27_s13, %s1653_s14  ;;  %p1659_p2 = scmp.lt.s32.totalorder %s1653_s14, %s1653_s14 }
   0x7   :  { %p1660_p3 = por %p1659_p2, %p1658_p1 }
   0x9   :  { %p1661_p4 = pnand %p1660_p3, %p1654_p0 }
   0xb   :  { %1664 = shalt.err (!%p1661_p4)
}
   0xc   :  { %s1732_s15 = smov 1024   ;;  %s1733_s16 = smov 64  }
   0xd   :  { %32 = dma.hbm_to_vmem [thread:$0]  %s2699_s1, 16384, %s27_s13, [#allocation6], %s1732_s15, %s1732_s15, %s1733_s16  }
   0xe   :  { %s1734_s19 = smov [#allocation2]   ;;  %s1735_s21 = smov [#allocation7]  }
   0xf   :  { %s17_s20 = sshll.u32 %s1734_s19, 4  ;;  %s39_s22 = sshll.u32 %s1735_s21, 4  ;;  %s18_s20 = int_to_ptr.vmem [resolvable:$true] %s17_s20  ;;  %s40_s22 = int_to_ptr.vmem [resolvable:$true] %s39_s22 }
  0x10   :  { %s1673_s23 = scalar_lea.vmem %s18_s20, 16  ;;  %s1677_s24 = scalar_lea.vmem %s18_s20, 32 }
  0x11   :  { %p1674_p5 = scmp.ne.s32.totalorder %s18_s20, %s1673_s23  ;;  %p1678_p6 = scmp.lt.s32.totalorder %s18_s20, %s18_s20 }
  0x12   :  { %p1679_p7 = scmp.lt.s32.totalorder %s1677_s24, %s1673_s23 }
  0x14   :  { %p1680_p8 = por %p1679_p7, %p1678_p6 }
  0x16   :  { %p1681_p9 = pnand %p1680_p8, %p1674_p5 }
  0x18   :  { %1684 = shalt.err (!%p1681_p9)
}
  0x19   :  { %20 = dma.hbm_to_vmem [thread:$0]  %s2698_s0, 16, %s18_s20, [#allocation3]  }
  0x1a   :  { %s1693_s27 = scalar_lea.vmem %s40_s22, 128  ;;  %p1698_p11 = scmp.lt.s32.totalorder %s40_s22, %s40_s22 }
  0x1b   :  { %p1694_p10 = scmp.ne.s32.totalorder %s40_s22, %s1693_s27  ;;  %p1699_p12 = scmp.lt.s32.totalorder %s1693_s27, %s1693_s27 }
  0x1d   :  { %p1700_p13 = por %p1699_p12, %p1698_p11 }
  0x1f   :  { %p1701_p0 = pnand %p1700_p13, %p1694_p10 }
  0x21   :  { %1704 = shalt.err (!%p1701_p0)
}
  0x22   :  { %42 = dma.hbm_to_vmem [thread:$0]  %s2700_s2, 128, %s40_s22, [#allocation6]  }
  0x23   :  { %1725 = dma.done.wait [#allocation3], 16  }
  0x24   :  { %1726 = vsyncadd [#allocation3], 4294967280 }
  0x25   :  { %1727 = dma.done.wait [#allocation6], 16512  }
  0x26   :  { %1728 = vsyncadd [#allocation6], 4294950784  ;;  %v1736_v0 = vmov 0.0   ;;  %v174_v1 = vld [vmem:[#allocation5 + $0x3c8] sm:$0xff]  ;;  %v176_v2 = vld [vmem:[#allocation5 + $0x3d8] sm:$0xff]  ;;  %s1744_s0 = smov [#allocation8]  }
  0x27   :  { %287 = vmatprep.mubr.f32.mxu0 %v1736_v0  ;;  %358 = vmatprep.mubr.f32.mxu1 %v1736_v0  ;;  %v173_v3 = vld [vmem:[#allocation5 + $0x3c0] sm:$0xff]  ;;  %v175_v4 = vld [vmem:[#allocation5 + $0x3d0] sm:$0xff]  ;;  %v166_v5 = vld [vmem:[#allocation5 + $0x388] sm:$0xff]  ;;  %s1525_s2 = sshll.u32 %s1744_s0, 4  ;;  %s1526_s2 = int_to_ptr.vmem [resolvable:$true] %s1525_s2 }
  0x28   :  { %223 = vmatprep.subr.mxu0 %v174_v1  ;;  %294 = vmatprep.subr.mxu1 %v176_v2  ;;  %v168_v6 = vld [vmem:[#allocation5 + $0x398] sm:$0xff]  ;;  %v165_v7 = vld [vmem:[#allocation5 + $0x380] sm:$0xff]  ;;  %v167_v8 = vld [vmem:[#allocation5 + $0x390] sm:$0xff]  ;;  %s1705_s29 = scalar_lea.vmem %s1526_s2, 128  ;;  %p1710_p2 = scmp.lt.s32.totalorder %s1526_s2, %s1526_s2 }
  0x29   :  { %224 = vmatpush1.msra.mxu0 %v173_v3  ;;  %295 = vmatpush1.msra.mxu1 %v175_v4  ;;  %v158_v9 = vld [vmem:[#allocation5 + $0x348] sm:$0xff]  ;;  %v160_v10 = vld [vmem:[#allocation5 + $0x358] sm:$0xff]  ;;  %v157_v11 = vld [vmem:[#allocation5 + $0x340] sm:$0xff]  ;;  %p1706_p1 = scmp.ne.s32.totalorder %s1526_s2, %s1705_s29  ;;  %p1711_p3 = scmp.lt.s32.totalorder %s1705_s29, %s1705_s29 }
  0x2a   :  { %225 = vmatprep.subr.mxu0 %v166_v5  ;;  %296 = vmatprep.subr.mxu1 %v168_v6  ;;  %v159_v12 = vld [vmem:[#allocation5 + $0x350] sm:$0xff]  ;;  %v150_v13 = vld [vmem:[#allocation5 + $0x308] sm:$0xff]  ;;  %v152_v14 = vld [vmem:[#allocation5 + $0x318] sm:$0xff] }
  0x2b   :  { %226 = vmatpush1.msra.mxu0 %v165_v7  ;;  %297 = vmatpush1.msra.mxu1 %v167_v8  ;;  %v149_v15 = vld [vmem:[#allocation5 + $0x300] sm:$0xff]  ;;  %v151_v16 = vld [vmem:[#allocation5 + $0x310] sm:$0xff]  ;;  %v142_v17 = vld [vmem:[#allocation5 + $0x2c8] sm:$0xff]  ;;  %p1712_p4 = por %p1711_p3, %p1710_p2 }
  0x2c   :  { %227 = vmatprep.subr.mxu0 %v158_v9  ;;  %298 = vmatprep.subr.mxu1 %v160_v10  ;;  %v144_v18 = vld [vmem:[#allocation5 + $0x2d8] sm:$0xff]  ;;  %v141_v19 = vld [vmem:[#allocation5 + $0x2c0] sm:$0xff]  ;;  %v143_v20 = vld [vmem:[#allocation5 + $0x2d0] sm:$0xff] }
  0x2d   :  { %228 = vmatpush1.msra.mxu0 %v157_v11  ;;  %299 = vmatpush1.msra.mxu1 %v159_v12  ;;  %v134_v21 = vld [vmem:[#allocation5 + $0x288] sm:$0xff]  ;;  %v136_v22 = vld [vmem:[#allocation5 + $0x298] sm:$0xff]  ;;  %v133_v23 = vld [vmem:[#allocation5 + $0x280] sm:$0xff]  ;;  %p1713_p5 = pnand %p1712_p4, %p1706_p1 }
  0x2e   :  { %229 = vmatprep.subr.mxu0 %v150_v13  ;;  %300 = vmatprep.subr.mxu1 %v152_v14  ;;  %v135_v24 = vld [vmem:[#allocation5 + $0x290] sm:$0xff]  ;;  %v126_v25 = vld [vmem:[#allocation5 + $0x248] sm:$0xff]  ;;  %v128_v26 = vld [vmem:[#allocation5 + $0x258] sm:$0xff] }
  0x2f   :  { %230 = vmatpush1.msra.mxu0 %v149_v15  ;;  %301 = vmatpush1.msra.mxu1 %v151_v16  ;;  %v125_v27 = vld [vmem:[#allocation5 + $0x240] sm:$0xff]  ;;  %v127_v28 = vld [vmem:[#allocation5 + $0x250] sm:$0xff]  ;;  %v118_v29 = vld [vmem:[#allocation5 + $0x208] sm:$0xff] }
  0x30   :  { %231 = vmatprep.subr.mxu0 %v142_v17  ;;  %302 = vmatprep.subr.mxu1 %v144_v18  ;;  %v120_v30 = vld [vmem:[#allocation5 + $0x218] sm:$0xff]  ;;  %v117_v31 = vld [vmem:[#allocation5 + $0x200] sm:$0xff]  ;;  %v119_v32 = vld [vmem:[#allocation5 + $0x210] sm:$0xff] }
  0x31   :  { %232 = vmatpush1.msra.mxu0 %v141_v19  ;;  %303 = vmatpush1.msra.mxu1 %v143_v20  ;;  %v110_v33 = vld [vmem:[#allocation5 + $0x1c8] sm:$0xff]  ;;  %v112_v34 = vld [vmem:[#allocation5 + $0x1d8] sm:$0xff]  ;;  %v109_v35 = vld [vmem:[#allocation5 + $0x1c0] sm:$0xff] }
  0x32   :  { %233 = vmatprep.subr.mxu0 %v134_v21  ;;  %304 = vmatprep.subr.mxu1 %v136_v22  ;;  %v111_v36 = vld [vmem:[#allocation5 + $0x1d0] sm:$0xff]  ;;  %v102_v37 = vld [vmem:[#allocation5 + $0x188] sm:$0xff]  ;;  %v104_v38 = vld [vmem:[#allocation5 + $0x198] sm:$0xff] }
  0x33   :  { %234 = vmatpush1.msra.mxu0 %v133_v23  ;;  %305 = vmatpush1.msra.mxu1 %v135_v24  ;;  %v101_v39 = vld [vmem:[#allocation5 + $0x180] sm:$0xff]  ;;  %v103_v40 = vld [vmem:[#allocation5 + $0x190] sm:$0xff]  ;;  %v94_v41 = vld [vmem:[#allocation5 + $0x148] sm:$0xff] }
  0x34   :  { %235 = vmatprep.subr.mxu0 %v126_v25  ;;  %306 = vmatprep.subr.mxu1 %v128_v26  ;;  %v96_v42 = vld [vmem:[#allocation5 + $0x158] sm:$0xff]  ;;  %v93_v43 = vld [vmem:[#allocation5 + $0x140] sm:$0xff]  ;;  %v95_v44 = vld [vmem:[#allocation5 + $0x150] sm:$0xff] }
  0x35   :  { %236 = vmatpush1.msra.mxu0 %v125_v27  ;;  %307 = vmatpush1.msra.mxu1 %v127_v28  ;;  %v86_v45 = vld [vmem:[#allocation5 + $0x108] sm:$0xff]  ;;  %v88_v46 = vld [vmem:[#allocation5 + $0x118] sm:$0xff]  ;;  %v85_v47 = vld [vmem:[#allocation5 + $0x100] sm:$0xff] }
  0x36   :  { %237 = vmatprep.subr.mxu0 %v118_v29  ;;  %308 = vmatprep.subr.mxu1 %v120_v30  ;;  %v87_v48 = vld [vmem:[#allocation5 + $0x110] sm:$0xff]  ;;  %v78_v49 = vld [vmem:[#allocation5 + $0xc8] sm:$0xff]  ;;  %v80_v50 = vld [vmem:[#allocation5 + $0xd8] sm:$0xff] }
  0x37   :  { %238 = vmatpush1.msra.mxu0 %v117_v31  ;;  %309 = vmatpush1.msra.mxu1 %v119_v32  ;;  %v77_v51 = vld [vmem:[#allocation5 + $0xc0] sm:$0xff]  ;;  %v79_v52 = vld [vmem:[#allocation5 + $0xd0] sm:$0xff]  ;;  %v70_v53 = vld [vmem:[#allocation5 + $0x88] sm:$0xff] }
  0x38   :  { %239 = vmatprep.subr.mxu0 %v110_v33  ;;  %310 = vmatprep.subr.mxu1 %v112_v34  ;;  %v72_v54 = vld [vmem:[#allocation5 + $0x98] sm:$0xff]  ;;  %v69_v55 = vld [vmem:[#allocation5 + $0x80] sm:$0xff]  ;;  %v71_v56 = vld [vmem:[#allocation5 + $0x90] sm:$0xff] }
  0x39   :  { %240 = vmatpush1.msra.mxu0 %v109_v35  ;;  %311 = vmatpush1.msra.mxu1 %v111_v36  ;;  %v62_v57 = vld [vmem:[#allocation5 + $0x48] sm:$0xff]  ;;  %v64_v58 = vld [vmem:[#allocation5 + $0x58] sm:$0xff]  ;;  %v61_v59 = vld [vmem:[#allocation5 + $0x40] sm:$0xff] }
  0x3a   :  { %241 = vmatprep.subr.mxu0 %v102_v37  ;;  %312 = vmatprep.subr.mxu1 %v104_v38  ;;  %v63_v60 = vld [vmem:[#allocation5 + $0x50] sm:$0xff]  ;;  %v54_v61 = vld [vmem:[#allocation5 + $0x8] sm:$0xff]  ;;  %v56_v62 = vld [vmem:[#allocation5 + $0x18] sm:$0xff] }
  0x3b   :  { %242 = vmatpush1.msra.mxu0 %v101_v39  ;;  %313 = vmatpush1.msra.mxu1 %v103_v40  ;;  %v53_v63 = vld [vmem:[#allocation5] sm:$0xff]  ;;  %v55_v1 = vld [vmem:[#allocation5 + $0x10] sm:$0xff]  ;;  %v1776_v2 = vld [vmem:[#allocation2] sm:$0x1] }
  0x3c   :  { %243 = vmatprep.subr.mxu0 %v94_v41  ;;  %314 = vmatprep.subr.mxu1 %v96_v42  ;;  %v178_v3 = vld [vmem:[#allocation5 + $0x3e8] sm:$0xff]  ;;  %v180_v4 = vld [vmem:[#allocation5 + $0x3f8] sm:$0xff]  ;;  %v177_v5 = vld [vmem:[#allocation5 + $0x3e0] sm:$0xff] }
  0x3d   :  { %244 = vmatpush1.msra.mxu0 %v93_v43  ;;  %315 = vmatpush1.msra.mxu1 %v95_v44  ;;  %v179_v6 = vld [vmem:[#allocation5 + $0x3f0] sm:$0xff]  ;;  %v170_v7 = vld [vmem:[#allocation5 + $0x3a8] sm:$0xff]  ;;  %v172_v8 = vld [vmem:[#allocation5 + $0x3b8] sm:$0xff] }
  0x3e   :  { %245 = vmatprep.subr.mxu0 %v86_v45  ;;  %316 = vmatprep.subr.mxu1 %v88_v46  ;;  %v169_v9 = vld [vmem:[#allocation5 + $0x3a0] sm:$0xff]  ;;  %v171_v10 = vld [vmem:[#allocation5 + $0x3b0] sm:$0xff]  ;;  %v162_v11 = vld [vmem:[#allocation5 + $0x368] sm:$0xff] }
  0x3f   :  { %246 = vmatpush1.msra.mxu0 %v85_v47  ;;  %317 = vmatpush1.msra.mxu1 %v87_v48  ;;  %v164_v12 = vld [vmem:[#allocation5 + $0x378] sm:$0xff]  ;;  %v161_v13 = vld [vmem:[#allocation5 + $0x360] sm:$0xff]  ;;  %v163_v14 = vld [vmem:[#allocation5 + $0x370] sm:$0xff] }
  0x40   :  { %247 = vmatprep.subr.mxu0 %v78_v49  ;;  %318 = vmatprep.subr.mxu1 %v80_v50  ;;  %v154_v15 = vld [vmem:[#allocation5 + $0x328] sm:$0xff]  ;;  %v156_v16 = vld [vmem:[#allocation5 + $0x338] sm:$0xff]  ;;  %v153_v17 = vld [vmem:[#allocation5 + $0x320] sm:$0xff] }
  0x41   :  { %248 = vmatpush1.msra.mxu0 %v77_v51  ;;  %319 = vmatpush1.msra.mxu1 %v79_v52  ;;  %v155_v18 = vld [vmem:[#allocation5 + $0x330] sm:$0xff]  ;;  %v146_v19 = vld [vmem:[#allocation5 + $0x2e8] sm:$0xff]  ;;  %v148_v20 = vld [vmem:[#allocation5 + $0x2f8] sm:$0xff] }
  0x42   :  { %249 = vmatprep.subr.mxu0 %v70_v53  ;;  %320 = vmatprep.subr.mxu1 %v72_v54  ;;  %v145_v21 = vld [vmem:[#allocation5 + $0x2e0] sm:$0xff]  ;;  %v147_v22 = vld [vmem:[#allocation5 + $0x2f0] sm:$0xff]  ;;  %v138_v23 = vld [vmem:[#allocation5 + $0x2a8] sm:$0xff] }
  0x43   :  { %250 = vmatpush1.msra.mxu0 %v69_v55  ;;  %321 = vmatpush1.msra.mxu1 %v71_v56  ;;  %v140_v24 = vld [vmem:[#allocation5 + $0x2b8] sm:$0xff]  ;;  %v137_v25 = vld [vmem:[#allocation5 + $0x2a0] sm:$0xff]  ;;  %v139_v26 = vld [vmem:[#allocation5 + $0x2b0] sm:$0xff] }
  0x44   :  { %251 = vmatprep.subr.mxu0 %v62_v57  ;;  %322 = vmatprep.subr.mxu1 %v64_v58  ;;  %v130_v27 = vld [vmem:[#allocation5 + $0x268] sm:$0xff]  ;;  %v132_v28 = vld [vmem:[#allocation5 + $0x278] sm:$0xff]  ;;  %v129_v29 = vld [vmem:[#allocation5 + $0x260] sm:$0xff] }
  0x45   :  { %252 = vmatpush1.msra.mxu0 %v61_v59  ;;  %323 = vmatpush1.msra.mxu1 %v63_v60  ;;  %v131_v30 = vld [vmem:[#allocation5 + $0x270] sm:$0xff]  ;;  %v122_v31 = vld [vmem:[#allocation5 + $0x228] sm:$0xff]  ;;  %v124_v32 = vld [vmem:[#allocation5 + $0x238] sm:$0xff] }
  0x46   :  { %253 = vmatprep.subr.mxu0 %v54_v61  ;;  %324 = vmatprep.subr.mxu1 %v56_v62  ;;  %v121_v33 = vld [vmem:[#allocation5 + $0x220] sm:$0xff]  ;;  %v123_v34 = vld [vmem:[#allocation5 + $0x230] sm:$0xff]  ;;  %v114_v35 = vld [vmem:[#allocation5 + $0x1e8] sm:$0xff] }
  0x47   :  { %254 = vmatpush1.msra.mxu0 %v53_v63  ;;  %325 = vmatpush1.msra.mxu1 %v55_v1  ;;  %v116_v36 = vld [vmem:[#allocation5 + $0x1f8] sm:$0xff]  ;;  %v113_v37 = vld [vmem:[#allocation5 + $0x1e0] sm:$0xff]  ;;  %v115_v38 = vld [vmem:[#allocation5 + $0x1f0] sm:$0xff] }
  0x48   :  { %288 = vmatmul.mubr.f32.vlgmr.msra.gmra.mxu0 %v1776_v2  ;;  %359 = vmatmul.mubr.f32.vlgmr.msra.gmra.mxu1 %v1776_v2  ;;  %v106_v39 = vld [vmem:[#allocation5 + $0x1a8] sm:$0xff]  ;;  %v108_v40 = vld [vmem:[#allocation5 + $0x1b8] sm:$0xff]  ;;  %v105_v41 = vld [vmem:[#allocation5 + $0x1a0] sm:$0xff] }
  0x49   :  { %365 = vmatprep.subr.mxu0 %v178_v3  ;;  %436 = vmatprep.subr.mxu1 %v180_v4  ;;  %v107_v42 = vld [vmem:[#allocation5 + $0x1b0] sm:$0xff]  ;;  %v98_v43 = vld [vmem:[#allocation5 + $0x168] sm:$0xff]  ;;  %v100_v44 = vld [vmem:[#allocation5 + $0x178] sm:$0xff] }
  0x4a   :  { %366 = vmatpush1.msra.mxu0 %v177_v5  ;;  %437 = vmatpush1.msra.mxu1 %v179_v6  ;;  %v97_v45 = vld [vmem:[#allocation5 + $0x160] sm:$0xff]  ;;  %v99_v46 = vld [vmem:[#allocation5 + $0x170] sm:$0xff]  ;;  %v90_v47 = vld [vmem:[#allocation5 + $0x128] sm:$0xff]  ;;  %v2702_v5 = vlaneseq }
  0x4b   :  { %367 = vmatprep.subr.mxu0 %v170_v7  ;;  %438 = vmatprep.subr.mxu1 %v172_v8  ;;  %v92_v48 = vld [vmem:[#allocation5 + $0x138] sm:$0xff]  ;;  %v89_v49 = vld [vmem:[#allocation5 + $0x120] sm:$0xff]  ;;  %v91_v50 = vld [vmem:[#allocation5 + $0x130] sm:$0xff] }
  0x4c   :  { %368 = vmatpush1.msra.mxu0 %v169_v9  ;;  %439 = vmatpush1.msra.mxu1 %v171_v10  ;;  %v82_v51 = vld [vmem:[#allocation5 + $0xe8] sm:$0xff]  ;;  %v84_v52 = vld [vmem:[#allocation5 + $0xf8] sm:$0xff]  ;;  %v81_v53 = vld [vmem:[#allocation5 + $0xe0] sm:$0xff]  ;;  %v1785_v6 = vshrl.u32 %v2702_v5, 7 }
  0x4d   :  { %369 = vmatprep.subr.mxu0 %v162_v11  ;;  %440 = vmatprep.subr.mxu1 %v164_v12  ;;  %v83_v54 = vld [vmem:[#allocation5 + $0xf0] sm:$0xff]  ;;  %v74_v55 = vld [vmem:[#allocation5 + $0xa8] sm:$0xff]  ;;  %v76_v56 = vld [vmem:[#allocation5 + $0xb8] sm:$0xff] }
  0x4e   :  { %370 = vmatpush1.msra.mxu0 %v161_v13  ;;  %441 = vmatpush1.msra.mxu1 %v163_v14  ;;  %v73_v57 = vld [vmem:[#allocation5 + $0xa0] sm:$0xff]  ;;  %v75_v58 = vld [vmem:[#allocation5 + $0xb0] sm:$0xff]  ;;  %v66_v59 = vld [vmem:[#allocation5 + $0x68] sm:$0xff]  ;;  %2728 = vst [vmem:[#allocation12_spill] sm:$0xff] %v1785_v6  ;;  %v185_v7 = vsub.s32 0, %v1785_v6  ;;  %v193_v8 = vsub.s32 2, %v1785_v6 }
  0x4f   :  { %371 = vmatprep.subr.mxu0 %v154_v15  ;;  %442 = vmatprep.subr.mxu1 %v156_v16  ;;  %v68_v60 = vld [vmem:[#allocation5 + $0x78] sm:$0xff]  ;;  %v65_v61 = vld [vmem:[#allocation5 + $0x60] sm:$0xff]  ;;  %v67_v62 = vld [vmem:[#allocation5 + $0x70] sm:$0xff] }
  0x50   :  { %372 = vmatpush1.msra.mxu0 %v153_v17  ;;  %443 = vmatpush1.msra.mxu1 %v155_v18  ;;  %v58_v63 = vld [vmem:[#allocation5 + $0x28] sm:$0xff]  ;;  %v60_v1 = vld [vmem:[#allocation5 + $0x38] sm:$0xff]  ;;  %v57_v3 = vld [vmem:[#allocation5 + $0x20] sm:$0xff] }
  0x51   :  { %373 = vmatprep.subr.mxu0 %v146_v19  ;;  %444 = vmatprep.subr.mxu1 %v148_v20  ;;  %v59_v4 = vld [vmem:[#allocation5 + $0x30] sm:$0xff]  ;;  %v1789_v9 = vld [vmem:[#allocation7] sm:$0xff]  ;;  %v189_v20 = vsub.s32 1, %v1785_v6 }
  0x52   :  { %374 = vmatpush1.msra.mxu0 %v145_v21  ;;  %445 = vmatpush1.msra.mxu1 %v147_v22  ;;  %v186_v10 = vrot.slane %v1789_v9, %v185_v7  ;;  %v194_v11 = vrot.slane %v1789_v9, %v193_v8 }
  0x53   :  { %375 = vmatprep.subr.mxu0 %v138_v23  ;;  %446 = vmatprep.subr.mxu1 %v140_v24  ;;  %v190_v24 = vrot.slane %v1789_v9, %v189_v20 }
  0x54   :  { %376 = vmatpush1.msra.mxu0 %v137_v25  ;;  %447 = vmatpush1.msra.mxu1 %v139_v26 }
  0x55   :  { %377 = vmatprep.subr.mxu0 %v130_v27  ;;  %448 = vmatprep.subr.mxu1 %v132_v28 }
  0x56   :  { %378 = vmatpush1.msra.mxu0 %v129_v29  ;;  %449 = vmatpush1.msra.mxu1 %v131_v30  ;;  %v2708_v30 = vmov 1326507024  }
  0x57   :  { %379 = vmatprep.subr.mxu0 %v122_v31  ;;  %450 = vmatprep.subr.mxu1 %v124_v32  ;;  %v2722_v32 = vmov 920167782  }
  0x58   :  { %380 = vmatpush1.msra.mxu0 %v121_v33  ;;  %451 = vmatpush1.msra.mxu1 %v123_v34 }
  0x59   :  { %381 = vmatprep.subr.mxu0 %v114_v35  ;;  %452 = vmatprep.subr.mxu1 %v116_v36 }
  0x5a   :  { %382 = vmatpush1.msra.mxu0 %v113_v37  ;;  %453 = vmatpush1.msra.mxu1 %v115_v38  ;;  %v2720_v38 = vmov 2131351028  }
  0x5b   :  { %383 = vmatprep.subr.mxu0 %v106_v39  ;;  %454 = vmatprep.subr.mxu1 %v108_v40  ;;  %v2718_v40 = vmov 2102212464  }
  0x5c   :  { %384 = vmatpush1.msra.mxu0 %v105_v41  ;;  %455 = vmatpush1.msra.mxu1 %v107_v42 }
  0x5d   :  { %385 = vmatprep.subr.mxu0 %v98_v43  ;;  %456 = vmatprep.subr.mxu1 %v100_v44  ;;  %v2711_v44 = vmov 2475754826  }
  0x5e   :  { %386 = vmatpush1.msra.mxu0 %v97_v45  ;;  %457 = vmatpush1.msra.mxu1 %v99_v46 }
  0x5f   :  { %387 = vmatprep.subr.mxu0 %v90_v47  ;;  %458 = vmatprep.subr.mxu1 %v92_v48 }
  0x60   :  { %388 = vmatpush1.msra.mxu0 %v89_v49  ;;  %459 = vmatpush1.msra.mxu1 %v91_v50 }
  0x61   :  { %389 = vmatprep.subr.mxu0 %v82_v51  ;;  %460 = vmatprep.subr.mxu1 %v84_v52  ;;  %v2713_v52 = vmov 683565275  }
  0x62   :  { %390 = vmatpush1.msra.mxu0 %v81_v53  ;;  %461 = vmatpush1.msra.mxu1 %v83_v54 }
  0x63   :  { %391 = vmatprep.subr.mxu0 %v74_v55  ;;  %462 = vmatprep.subr.mxu1 %v76_v56 }
  0x64   :  { %392 = vmatpush1.msra.mxu0 %v73_v57  ;;  %463 = vmatpush1.msra.mxu1 %v75_v58 }
  0x65   :  { %393 = vmatprep.subr.mxu0 %v66_v59  ;;  %464 = vmatprep.subr.mxu1 %v68_v60  ;;  %v197_v59 = vsub.s32 3, %v1785_v6 }
  0x66   :  { %394 = vmatpush1.msra.mxu0 %v65_v61  ;;  %465 = vmatpush1.msra.mxu1 %v67_v62 }
  0x67   :  { %395 = vmatprep.subr.mxu0 %v58_v63  ;;  %466 = vmatprep.subr.mxu1 %v60_v1 }
  0x68   :  { %396 = vmatpush1.msra.mxu0 %v57_v3  ;;  %429 = vmatprep.mubr.f32.mxu0 %v1736_v0 }
  0x69   :  { %467 = vmatpush1.msra.mxu1 %v59_v4  ;;  %500 = vmatprep.mubr.f32.mxu1 %v1736_v0 }
  0x6a   :  { %430 = vmatmul.mubr.f32.vlgmr.msra.gmra.mxu0 %v1776_v2  ;;  %501 = vmatmul.mubr.f32.vlgmr.msra.gmra.mxu1 %v1776_v2 }
 0x108   :  { %v289_v12 = vpop.f32.mrf.mxu0  ;;  %v360_v0 = vpop.f32.mrf.mxu1 }
 0x109   :  { %v1793_v13 = vadd.f32 %v289_v12, %v186_v10  ;;  %v1795_v14 = vadd.f32 %v360_v0, %v194_v11  ;;  %v198_v10 = vrot.slane %v1789_v9, %v197_v59 }
 0x10a   :  { %v291_v26 = vpop.f32.mrf.mxu0 }
 0x10b   :  { %v623_v2 = vand.u32 2139095040, %v1793_v13  ;;  %v831_v15 = vand.u32 2139095040, %v1795_v14  ;;  %v1803_v28 = vadd.f32 %v291_v26, %v190_v24  ;;  %v620_v29 = vand.u32 2147483647, %v1793_v13 }
 0x10c   :  { %v2707_v62 = vand.u32 2147483647, %v1795_v14 }
 0x10d   :  { %v624_v16 = vshrl.u32 %v623_v2, 23  ;;  %v832_v17 = vshrl.u32 %v831_v15, 23  ;;  %v727_v35 = vand.u32 2139095040, %v1803_v28  ;;  %v627_v43 = vand.u32 8388607, %v620_v29 }
 0x10e   :  { %v835_v12 = vand.u32 8388607, %v2707_v62 }
 0x10f   :  { %v1535_v18 = vadd.s32 4294967169, %v624_v16  ;;  %v1543_v21 = vadd.s32 4294967169, %v832_v17  ;;  %v728_v51 = vshrl.u32 %v727_v35, 23  ;;  %v628_v60 = vor.u32 8388608, %v627_v43 }
 0x111   :  { %v630_v19 = vadd.s32 1, %v1535_v18  ;;  %v838_v25 = vadd.s32 1, %v1543_v21  ;;  %v1539_v63 = vadd.s32 4294967169, %v728_v51  ;;  %v668_v11 = vshll.u32 %v628_v60, 8 }
 0x113   :  { %vm631_vm0 = vcmp.gt.s32.totalorder %v630_v19, 0  ;;  %vm839_vm1 = vcmp.gt.s32.totalorder %v838_v25, 0  ;;  %v734_v0 = vadd.s32 1, %v1539_v63 }
 0x114   :  { %v632_v22 = vsel %vm631_vm0, %v630_v19, 0  ;;  %v840_v34 = vsel %vm839_vm1, %v838_v25, 0 }
 0x115   :  { %v634_v23 = vand.u32 31, %v632_v22  ;;  %v1812_v37 = vshrl.u32 %v632_v22, 5  ;;  %v842_v47 = vand.u32 31, %v840_v34  ;;  %v1853_v15 = vshrl.u32 %v840_v34, 5  ;;  %v362_v22 = vpop.f32.mrf.mxu1 }
 0x116   :  { %vm735_vm6 = vcmp.gt.s32.totalorder %v734_v0, 0 }
 0x117   :  { %v1801_v27 = vsub.s32 32, %v634_v23  ;;  %v649_v36 = vshll.u32 %v2722_v32, %v634_v23  ;;  %v646_v42 = vshll.u32 %v2718_v40, %v634_v23  ;;  %v640_v48 = vshll.u32 %v2711_v44, %v634_v23 }
 0x118   :  { %v643_v49 = vshll.u32 %v2720_v38, %v634_v23  ;;  %v637_v53 = vshll.u32 %v2713_v52, %v634_v23  ;;  %vm655_vm2 = vcmp.lt.s32.totalorder %v1812_v37, 4  ;;  %v1829_v58 = vsub.s32 32, %v842_v47 }
 0x119   :  { %v650_v31 = vshrl.u32 %v2708_v30, %v1801_v27  ;;  %v647_v33 = vshrl.u32 %v2722_v32, %v1801_v27  ;;  %v641_v39 = vshrl.u32 %v2720_v38, %v1801_v27  ;;  %v644_v41 = vshrl.u32 %v2718_v40, %v1801_v27 }
 0x11a   :  { %v638_v45 = vshrl.u32 %v2711_v44, %v1801_v27  ;;  %vm652_vm3 = vcmp.lt.s32.totalorder %v1812_v37, 1  ;;  %vm654_vm4 = vcmp.lt.s32.totalorder %v1812_v37, 3  ;;  %v855_v8 = vshrl.u32 %v2722_v32, %v1829_v58 }
 0x11b   :  { %v651_v46 = vor.u32 %v650_v31, %v649_v36  ;;  %v648_v50 = vor.u32 %v647_v33, %v646_v42  ;;  %v642_v54 = vor.u32 %v641_v39, %v640_v48  ;;  %v645_v55 = vor.u32 %v644_v41, %v643_v49 }
 0x11c   :  { %v639_v56 = vor.u32 %v638_v45, %v637_v53  ;;  %vm653_vm5 = vcmp.lt.s32.totalorder %v1812_v37, 2  ;;  %v854_v16 = vshll.u32 %v2718_v40, %v842_v47  ;;  %v858_v17 = vshrl.u32 %v2708_v30, %v1829_v58 }
 0x11d   :  { %v665_v57 = vsel %vm655_vm2, %v651_v46, 1326507024  ;;  %v661_v61 = vsel %vm655_vm2, %v648_v50, 920167782  ;;  %v664_v1 = vsel %vm652_vm3, %v642_v54, %v645_v55  ;;  %v846_v19 = vshrl.u32 %v2711_v44, %v1829_v58 }
 0x11e   :  { %v666_v3 = vsel %vm654_vm4, %v648_v50, %v665_v57  ;;  %v660_v4 = vsel %vm652_vm3, %v639_v56, %v642_v54  ;;  %v662_v7 = vsel %vm654_vm4, %v645_v55, %v661_v61  ;;  %v849_v20 = vshrl.u32 %v2720_v38, %v1829_v58 }
 0x11f   :  { %v667_v2 = vsel %vm653_vm5, %v664_v1, %v666_v3  ;;  %v663_v18 = vsel %vm653_vm5, %v660_v4, %v662_v7  ;;  %v852_v21 = vshrl.u32 %v2718_v40, %v1829_v58  ;;  %v845_v23 = vshll.u32 %v2713_v52, %v842_v47 }
 0x120   :  { %v848_v24 = vshll.u32 %v2711_v44, %v842_v47  ;;  %v856_v25 = vor.u32 %v855_v8, %v854_v16  ;;  %v857_v26 = vshll.u32 %v2722_v32, %v842_v47  ;;  %v851_v34 = vshll.u32 %v2720_v38, %v842_v47 }
 0x121   :  { %v1869_v31 = vmul.u32.u64.low %v668_v11, %v667_v2  ;;  %v1870_v33 = vmul.u32.u64.high %v668_v11, %v667_v2, %v1869_v31  ;;  %v1873_v35 = vmul.u32.u64.low %v668_v11, %v663_v18  ;;  %v1874_v36 = vmul.u32.u64.high %v668_v11, %v663_v18, %v1873_v35 }
 0x122   :  { %v859_v39 = vor.u32 %v858_v17, %v857_v26  ;;  %v1877_v41 = vadd.f32 %v362_v22, %v198_v10  ;;  %v847_v42 = vor.u32 %v846_v19, %v845_v23  ;;  %v850_v43 = vor.u32 %v849_v20, %v848_v24 }
 0x123   :  { %v853_v45 = vor.u32 %v852_v21, %v851_v34  ;;  %vm863_vm7 = vcmp.lt.s32.totalorder %v1853_v15, 4  ;;  %v736_v48 = vsel %vm735_vm6, %v734_v0, 0  ;;  %v657_v47 = vsel %vm655_vm2, %v645_v55, 2102212464 }
 0x124   :  { %v869_v46 = vsel %vm863_vm7, %v856_v25, 920167782  ;;  %v836_v49 = vor.u32 8388608, %v835_v12  ;;  %v636_v50 = vshrl.u32 %v2713_v52, %v1801_v27  ;;  %vm860_vm8 = vcmp.lt.s32.totalorder %v1853_v15, 1 }
 0x125   :  { %vm862_vm9 = vcmp.lt.s32.totalorder %v1853_v15, 3  ;;  %v873_v51 = vsel %vm863_vm7, %v859_v39, 1326507024  ;;  %v868_v53 = vsel %vm860_vm8, %v847_v42, %v850_v43  ;;  %v738_v59 = vand.u32 31, %v736_v48 }
 0x126   :  { %v870_v57 = vsel %vm862_vm9, %v853_v45, %v869_v46  ;;  %v935_v55 = vand.u32 2139095040, %v1877_v41  ;;  %v656_v60 = vsel %vm652_vm3, %v636_v50, %v639_v56  ;;  %v658_v27 = vsel %vm654_vm4, %v642_v54, %v657_v47 }
 0x127   :  { %vm861_vm10 = vcmp.lt.s32.totalorder %v1853_v15, 2  ;;  %v872_v61 = vsel %vm860_vm8, %v850_v43, %v853_v45  ;;  %v874_v63 = vsel %vm862_vm9, %v856_v25, %v873_v51  ;;  %v678_v1 = vadd.s32 1, %v1874_v36 }
 0x128   :  { %v871_v3 = vsel %vm861_vm10, %v868_v53, %v870_v57  ;;  %v876_v4 = vshll.u32 %v836_v49, 8  ;;  %v659_v56 = vsel %vm653_vm5, %v656_v60, %v658_v27  ;;  %vm677_vm11 = vc.u32 %v1870_v33, %v1873_v35 }
 0x129   :  { %v1911_v54 = vsub.s32 32, %v738_v59  ;;  %v936_v7 = vshrl.u32 %v935_v55, 23  ;;  %v875_v8 = vsel %vm861_vm10, %v872_v61, %v874_v63  ;;  %v675_v0 = vmul.u32 %v668_v11, %v659_v56 }
 0x12a   :  { %v1915_v10 = vmul.u32.u64.low %v876_v4, %v871_v3  ;;  %v1916_v12 = vmul.u32.u64.high %v876_v4, %v871_v3, %v1915_v10  ;;  %v679_v2 = vsel %vm677_vm11, %v678_v1, %v1874_v36  ;;  %v2706_v16 = vand.u32 2147483647, %v1803_v28 }
 0x12b   :  { %v1921_v37 = vmul.u32.u64.low %v876_v4, %v875_v8  ;;  %v1922_v17 = vmul.u32.u64.high %v876_v4, %v875_v8, %v1921_v37  ;;  %v751_v18 = vshrl.u32 %v2722_v32, %v1911_v54  ;;  %v1547_v19 = vadd.s32 4294967169, %v936_v7 }
 0x12c   :  { %v754_v20 = vshrl.u32 %v2708_v30, %v1911_v54  ;;  %v680_v21 = vadd.s32 %v679_v2, %v675_v0  ;;  %v865_v22 = vsel %vm863_vm7, %v853_v45, 2102212464  ;;  %v1930_v23 = vshrl.u32 %v736_v48, 5 }
 0x12d   :  { %v750_v11 = vshll.u32 %v2718_v40, %v738_v59  ;;  %v742_v24 = vshrl.u32 %v2711_v44, %v1911_v54  ;;  %v745_v25 = vshrl.u32 %v2720_v38, %v1911_v54  ;;  %v748_v26 = vshrl.u32 %v2718_v40, %v1911_v54 }
 0x12e   :  { %v753_v31 = vshll.u32 %v2722_v32, %v738_v59  ;;  %v844_v34 = vshrl.u32 %v2713_v52, %v1829_v58  ;;  %v731_v36 = vand.u32 8388607, %v2706_v16  ;;  %v942_v45 = vadd.s32 1, %v1547_v19 }
 0x12f   :  { %v752_v39 = vor.u32 %v751_v18, %v750_v11  ;;  %v741_v46 = vshll.u32 %v2713_v52, %v738_v59  ;;  %v744_v48 = vshll.u32 %v2711_v44, %v738_v59  ;;  %v747_v47 = vshll.u32 %v2720_v38, %v738_v59 }
 0x130   :  { %v755_v49 = vor.u32 %v754_v20, %v753_v31  ;;  %v681_v50 = vadd.s32 536870912, %v680_v21  ;;  %v864_v51 = vsel %vm860_vm8, %v844_v34, %v847_v42  ;;  %v866_v53 = vsel %vm862_vm9, %v850_v43, %v865_v22 }
 0x131   :  { %v886_v58 = vadd.s32 1, %v1916_v12  ;;  %v743_v57 = vor.u32 %v742_v24, %v741_v46  ;;  %v746_v55 = vor.u32 %v745_v25, %v744_v48  ;;  %v749_v60 = vor.u32 %v748_v26, %v747_v47 }
 0x132   :  { %vm759_vm12 = vcmp.lt.s32.totalorder %v1930_v23, 4  ;;  %vm885_vm13 = vc.u32 %v1922_v17, %v1915_v10  ;;  %vm943_vm14 = vcmp.gt.s32.totalorder %v942_v45, 0  ;;  %v867_v42 = vsel %vm861_vm10, %v864_v51, %v866_v53 }
 0x133   :  { %v765_v59 = vsel %vm759_vm12, %v752_v39, 920167782  ;;  %v769_v43 = vsel %vm759_vm12, %v755_v49, 1326507024  ;;  %v1961_v27 = vshrl.u32 %v681_v50, 30  ;;  %v732_v61 = vor.u32 8388608, %v731_v36  ;;  %v431_v36 = vpop.f32.mrf.mxu0 }
 0x134   :  { %vm756_vm15 = vcmp.lt.s32.totalorder %v1930_v23, 1  ;;  %vm758_vm0 = vcmp.lt.s32.totalorder %v1930_v23, 3  ;;  %v887_v63 = vsel %vm885_vm13, %v886_v58, %v1916_v12  ;;  %v944_v15 = vsel %vm943_vm14, %v942_v45, 0 }
 0x135   :  { %v764_v1 = vsel %vm756_vm15, %v743_v57, %v746_v55  ;;  %v766_v3 = vsel %vm758_vm0, %v749_v60, %v765_v59  ;;  %v883_v56 = vmul.u32 %v876_v4, %v867_v42  ;;  %v768_v7 = vsel %vm756_vm15, %v746_v55, %v749_v60 }
 0x136   :  { %v770_v8 = vsel %vm758_vm0, %v752_v39, %v769_v43  ;;  %vm757_vm1 = vcmp.lt.s32.totalorder %v1930_v23, 2  ;;  %v946_v2 = vand.u32 31, %v944_v15  ;;  %v683_v37 = vshll.u32 %v1961_v27, 30 }
 0x137   :  { %v888_v0 = vadd.s32 %v887_v63, %v883_v56  ;;  %v767_v12 = vsel %vm757_vm1, %v764_v1, %v766_v3  ;;  %v771_v18 = vsel %vm757_vm1, %v768_v7, %v770_v8  ;;  %v772_v19 = vshll.u32 %v732_v61, 8 }
 0x138   :  { %v201_v4 = vsub.s32 4, %v1785_v6  ;;  %v947_v26 = vsub.s32 32, %v946_v2  ;;  %v1988_v31 = vsub.s32 %v680_v21, %v683_v37  ;;  %v761_v39 = vsel %vm759_vm12, %v749_v60, 2102212464 }
 0x139   :  { %v1981_v20 = vmul.u32.u64.low %v772_v19, %v767_v12  ;;  %v1982_v22 = vmul.u32.u64.high %v772_v19, %v767_v12, %v1981_v20  ;;  %v889_v11 = vadd.s32 536870912, %v888_v0  ;;  %v209_v45 = vsub.s32 6, %v1785_v6 }
 0x13a   :  { %v1985_v24 = vmul.u32.u64.low %v772_v19, %v771_v18  ;;  %v1986_v25 = vmul.u32.u64.high %v772_v19, %v771_v18, %v1985_v24  ;;  %v202_v34 = vrot.slane %v1789_v9, %v201_v4  ;;  %v740_v48 = vshrl.u32 %v2713_v52, %v1911_v54 }
 0x13b   :  { %v1994_v46 = vshrl.u32 %v889_v11, 30  ;;  %v959_v47 = vshrl.u32 %v2722_v32, %v947_v26  ;;  %v205_v49 = vsub.s32 5, %v1785_v6  ;;  %v686_v21 = vsub.s32 0, %v1988_v31 }
 0x13c   :  { %v2705_v50 = vand.u32 2147483647, %v1877_v41  ;;  %v962_v51 = vshrl.u32 %v2708_v30, %v947_v26  ;;  %v2003_v53 = vadd.f32 %v431_v36, %v202_v34  ;;  %v760_v58 = vsel %vm756_vm15, %v740_v48, %v743_v57  ;;  %v502_v34 = vpop.f32.mrf.mxu1 }
 0x13d   :  { %v762_v60 = vsel %vm758_vm0, %v746_v55, %v761_v39  ;;  %v2009_v59 = vshrl.u32 %v944_v15, 5  ;;  %v958_v54 = vshll.u32 %v2718_v40, %v946_v2  ;;  %v950_v42 = vshrl.u32 %v2711_v44, %v947_v26 }
 0x13e   :  { %v953_v43 = vshrl.u32 %v2720_v38, %v947_v26  ;;  %v956_v61 = vshrl.u32 %v2718_v40, %v947_v26  ;;  %v961_v63 = vshll.u32 %v2722_v32, %v946_v2  ;;  %v891_v1 = vshll.u32 %v1994_v46, 30 }
 0x13f   :  { %vm781_vm2 = vc.u32 %v1986_v25, %v1981_v20  ;;  %v782_v57 = vadd.s32 1, %v1982_v22  ;;  %v960_v55 = vor.u32 %v959_v47, %v958_v54  ;;  %v949_v3 = vshll.u32 %v2713_v52, %v946_v2 }
 0x140   :  { %v952_v15 = vshll.u32 %v2711_v44, %v946_v2  ;;  %v955_v56 = vshll.u32 %v2720_v38, %v946_v2  ;;  %v963_v7 = vor.u32 %v962_v51, %v961_v63  ;;  %v763_v8 = vsel %vm757_vm1, %v760_v58, %v762_v60 }
 0x141   :  { %v939_v12 = vand.u32 8388607, %v2705_v50  ;;  %v1039_v37 = vand.u32 2139095040, %v2003_v53  ;;  %v210_v18 = vrot.slane %v1789_v9, %v209_v45  ;;  %v951_v4 = vor.u32 %v950_v42, %v949_v3 }
 0x142   :  { %v954_v11 = vor.u32 %v953_v43, %v952_v15  ;;  %v957_v24 = vor.u32 %v956_v61, %v955_v56  ;;  %vm967_vm3 = vcmp.lt.s32.totalorder %v2009_v59, 4  ;;  %v1536_v36 = vmin.u32 %v686_v21, %v1988_v31 }
 0x143   :  { %v783_v23 = vsel %vm781_vm2, %v782_v57, %v1982_v22  ;;  %v973_v2 = vsel %vm967_vm3, %v960_v55, 920167782  ;;  %v1040_v39 = vshrl.u32 %v1039_v37, 23  ;;  %v2037_v48 = vsub.s32 %v888_v0, %v891_v1 }
 0x144   :  { %v779_v45 = vmul.u32 %v772_v19, %v763_v8  ;;  %v977_v47 = vsel %vm967_vm3, %v963_v7, 1326507024  ;;  %v2042_v51 = vrot.slane %v1789_v9, %v205_v49  ;;  %vm964_vm4 = vcmp.lt.s32.totalorder %v2009_v59, 1 }
 0x145   :  { %vm966_vm5 = vcmp.lt.s32.totalorder %v2009_v59, 3  ;;  %v1551_v21 = vadd.s32 4294967169, %v1040_v39  ;;  %v2046_v58 = vadd.f32 %v502_v34, %v210_v18  ;;  %v940_v60 = vor.u32 8388608, %v939_v12 }
 0x146   :  { %v2048_v22 = vadd.s32 %v783_v23, %v779_v45  ;;  %v972_v0 = vsel %vm964_vm4, %v951_v4, %v954_v11  ;;  %v974_v19 = vsel %vm966_vm5, %v957_v24, %v973_v2  ;;  %v688_v54 = vclz %v1536_v36 }
 0x147   :  { %2729 = vst [vmem:[#allocation13_spill] sm:$0xff] %v2046_v58  ;;  %v976_v49 = vsel %vm964_vm4, %v954_v11, %v957_v24  ;;  %v978_v42 = vsel %vm966_vm5, %v960_v55, %v977_v47  ;;  %v1046_v43 = vadd.s32 1, %v1551_v21  ;;  %v894_v61 = vsub.s32 0, %v2037_v48 }
 0x148   :  { %v948_v63 = vshrl.u32 %v2713_v52, %v947_v26  ;;  %vm965_vm6 = vcmp.lt.s32.totalorder %v2009_v59, 2  ;;  %v2703_v1 = vand.u32 2147483647, %v2003_v53  ;;  %v969_v57 = vsel %vm967_vm3, %v957_v24, 2102212464 }
 0x149   :  { %v975_v3 = vsel %vm965_vm6, %v972_v0, %v974_v19  ;;  %vm1047_vm7 = vcmp.gt.s32.totalorder %v1046_v43, 0  ;;  %v1247_v15 = vand.u32 2139095040, %v2046_v58  ;;  %v785_v55 = vadd.s32 536870912, %v2048_v22 }
 0x14a   :  { %v979_v56 = vsel %vm965_vm6, %v976_v49, %v978_v42  ;;  %v2070_v7 = vshll.u32 %v940_v60, 8  ;;  %v1048_v26 = vsel %vm1047_vm7, %v1046_v43, 0  ;;  %vm622_vm8 = vcmp.lt.s32.totalorder %v1793_v13, 0 }
 0x14b   :  { %v968_v8 = vsel %vm964_vm4, %v948_v63, %v951_v4  ;;  %v1050_v12 = vand.u32 31, %v1048_v26  ;;  %v213_v37 = vsub.s32 7, %v1785_v6  ;;  %v970_v18 = vsel %vm966_vm5, %v954_v11, %v969_v57 }
 0x14c   :  { %v2079_v24 = vmul.u32.u64.low %v2070_v7, %v975_v3  ;;  %v2080_v34 = vmul.u32.u64.high %v2070_v7, %v975_v3, %v2079_v24  ;;  %v1043_v36 = vand.u32 8388607, %v2703_v1  ;;  %v1248_v4 = vshrl.u32 %v1247_v15, 23 }
 0x14d   :  { %v2086_v23 = vmul.u32.u64.low %v2070_v7, %v979_v56  ;;  %v2087_v2 = vmul.u32.u64.high %v2070_v7, %v979_v56, %v2086_v23  ;;  %v1051_v39 = vsub.s32 32, %v1050_v12  ;;  %v2089_v45 = vadd.s32 4294967294, %v688_v54 }
 0x14e   :  { %v706_v47 = vsub.s32 4, %v1961_v27  ;;  %v2093_v11 = vmin.u32 %v894_v61, %v2037_v48  ;;  %v2095_v21 = vshrl.u32 %v785_v55, 30  ;;  %v971_v60 = vsel %vm965_vm6, %v968_v8, %v970_v18 }
 0x14f   :  { %v1054_v0 = vshrl.u32 %v2711_v44, %v1051_v39  ;;  %v1057_v19 = vshrl.u32 %v2720_v38, %v1051_v39  ;;  %v1060_v49 = vshrl.u32 %v2718_v40, %v1051_v39  ;;  %v1044_v42 = vor.u32 8388608, %v1043_v36 }
 0x150   :  { %v1053_v54 = vshll.u32 %v2713_v52, %v1050_v12  ;;  %v1056_v43 = vshll.u32 %v2711_v44, %v1050_v12  ;;  %v1063_v63 = vshrl.u32 %v2722_v32, %v1051_v39  ;;  %v1049_v61 = vshrl.u32 %v1048_v26, 5 }
 0x151   :  { %v1059_v57 = vshll.u32 %v2720_v38, %v1050_v12  ;;  %v1062_v3 = vshll.u32 %v2718_v40, %v1050_v12  ;;  %v1559_v59 = vadd.s32 4294967169, %v1248_v4  ;;  %v2110_v15 = vsel %vm622_vm8, %v706_v47, %v1961_v27 }
 0x152   :  { %v896_v55 = vclz %v2093_v11  ;;  %v1055_v56 = vor.u32 %v1054_v0, %v1053_v54  ;;  %v1058_v8 = vor.u32 %v1057_v19, %v1056_v43  ;;  %vm1538_vm9 = vcmp.lt.s32.totalorder %v2089_v45, 0 }
 0x153   :  { %v1061_v18 = vor.u32 %v1060_v49, %v1059_v57  ;;  %v1064_v36 = vor.u32 %v1063_v63, %v1062_v3  ;;  %v1065_v26 = vshll.u32 %v2722_v32, %v1050_v12  ;;  %v1066_v23 = vshrl.u32 %v2708_v30, %v1051_v39 }
 0x154   :  { %v787_v5 = vshll.u32 %v2095_v21, 30  ;;  %v987_v4 = vmul.u32 %v2070_v7, %v971_v60  ;;  %v990_v1 = vadd.s32 1, %v2080_v34  ;;  %v1084_v27 = vshll.u32 %v1044_v42, 8 }
 0x155   :  { %vm989_vm10 = vc.u32 %v2087_v2, %v2079_v24  ;;  %v1067_v47 = vor.u32 %v1066_v23, %v1065_v26  ;;  %vm1068_vm11 = vcmp.lt.s32.totalorder %v1049_v61, 1  ;;  %v1254_v11 = vadd.s32 1, %v1559_v59 }
 0x156   :  { %v1052_v0 = vshrl.u32 %v2713_v52, %v1051_v39  ;;  %vm1070_vm12 = vcmp.lt.s32.totalorder %v1049_v61, 3  ;;  %vm1071_vm13 = vcmp.lt.s32.totalorder %v1049_v61, 4  ;;  %v1076_v12 = vsel %vm1068_vm11, %v1055_v56, %v1058_v8  ;;  %v433_v39 = vpop.f32.mrf.mxu0 }
 0x157   :  { %v1073_v19 = vsel %vm1071_vm13, %v1061_v18, 2102212464  ;;  %v1077_v49 = vsel %vm1071_vm13, %v1064_v36, 920167782  ;;  %v1080_v54 = vsel %vm1068_vm11, %v1058_v8, %v1061_v18  ;;  %v1081_v43 = vsel %vm1071_vm13, %v1067_v47, 1326507024 }
 0x158   :  { %v991_v7 = vsel %vm989_vm10, %v990_v1, %v2080_v34  ;;  %vm1069_vm14 = vcmp.lt.s32.totalorder %v1049_v61, 2  ;;  %v1078_v60 = vsel %vm1070_vm12, %v1061_v18, %v1077_v49  ;;  %v1082_v42 = vsel %vm1070_vm12, %v1064_v36, %v1081_v43 }
 0x159   :  { %v1072_v63 = vsel %vm1068_vm11, %v1052_v0, %v1055_v56  ;;  %v1079_v57 = vsel %vm1069_vm14, %v1076_v12, %v1078_v60  ;;  %v1083_v3 = vsel %vm1069_vm14, %v1080_v54, %v1082_v42  ;;  %vm1255_vm15 = vcmp.gt.s32.totalorder %v1254_v11, 0 }
 0x15a   :  { %v1074_v59 = vsel %vm1070_vm12, %v1058_v8, %v1073_v19  ;;  %v2128_v26 = vmul.u32.u64.low %v1084_v27, %v1083_v3  ;;  %v2129_v23 = vmul.u32.u64.high %v1084_v27, %v1083_v3, %v2128_v26  ;;  %v1256_v47 = vsel %vm1255_vm15, %v1254_v11, 0 }
 0x15b   :  { %v2132_v1 = vsub.s32 %v2048_v22, %v787_v5  ;;  %v2134_v34 = vmul.u32.u64.low %v1084_v27, %v1079_v57  ;;  %v2135_v18 = vmul.u32.u64.high %v1084_v27, %v1079_v57, %v2134_v34  ;;  %v2704_v56 = vand.u32 2147483647, %v2046_v58 }
 0x15c   :  { %v2139_v36 = vadd.s32 %v991_v7, %v987_v4  ;;  %v1258_v0 = vand.u32 31, %v1256_v47  ;;  %v2142_v12 = vadd.f32 %v433_v39, %v2042_v51  ;;  %v2147_v8 = vrot.slane %v1789_v9, %v213_v37 }
 0x15d   :  { %vm2151_vm0 = vcmp.le.f32.partialorder %v620_v29, 0.7853982  ;;  %v2157_v22 = vadd.s32 %v1873_v35, %v1870_v33  ;;  %v2161_v4 = vadd.s32 %v1915_v10, %v1922_v17  ;;  %v1075_v51 = vsel %vm1069_vm14, %v1072_v63, %v1074_v59 }
 0x15e   :  { %2730 = vst [vmem:[#allocation14_spill] sm:$0xff] %v2142_v12  ;;  %v2167_v9 = vsel %vm1538_vm9, 0, %v2089_v45  ;;  %v709_v29 = vsel %vm2151_vm0, 0, %v2110_v15  ;;  %v1545_v37 = vadd.s32 4294967294, %v896_v55  ;;  %vm1093_vm1 = vc.u32 %v2129_v23, %v2134_v34 }
 0x15f   :  { %v790_v33 = vsub.s32 0, %v2132_v1  ;;  %v1094_v35 = vadd.s32 1, %v2135_v18  ;;  %v1251_v10 = vand.u32 8388607, %v2704_v56  ;;  %v1259_v17 = vsub.s32 32, %v1258_v0 }
 0x160   :  { %v993_v61 = vadd.s32 536870912, %v2139_v36  ;;  %v1091_v45 = vmul.u32 %v1084_v27, %v1075_v51  ;;  %v1261_v11 = vshll.u32 %v2713_v52, %v1258_v0  ;;  %v1143_v19 = vand.u32 2139095040, %v2142_v12 }
 0x161   :  { %v1095_v55 = vsel %vm1093_vm1, %v1094_v35, %v2135_v18  ;;  %v1262_v49 = vshrl.u32 %v2711_v44, %v1259_v17  ;;  %v1264_v54 = vshll.u32 %v2711_v44, %v1258_v0  ;;  %v1265_v43 = vshrl.u32 %v2720_v38, %v1259_v17 }
 0x162   :  { %v1096_v7 = vadd.s32 %v1095_v55, %v1091_v45  ;;  %v1257_v60 = vshrl.u32 %v1256_v47, 5  ;;  %v1267_v42 = vshll.u32 %v2720_v38, %v1258_v0  ;;  %v1268_v63 = vshrl.u32 %v2718_v40, %v1259_v17 }
 0x163   :  { %v1263_v57 = vor.u32 %v1262_v49, %v1261_v11  ;;  %v1266_v27 = vor.u32 %v1265_v43, %v1264_v54  ;;  %v1270_v3 = vshll.u32 %v2718_v40, %v1258_v0  ;;  %v1271_v39 = vshrl.u32 %v2722_v32, %v1259_v17 }
 0x164   :  { %v1097_v59 = vadd.s32 536870912, %v1096_v7  ;;  %v1269_v26 = vor.u32 %v1268_v63, %v1267_v42  ;;  %v1273_v18 = vshll.u32 %v2722_v32, %v1258_v0  ;;  %v1274_v51 = vshrl.u32 %v2708_v30, %v1259_v17 }
 0x165   :  { %v692_v35 = vsub.s32 32, %v2167_v9  ;;  %v696_v47 = vsub.s32 4294967266, %v2167_v9  ;;  %v1272_v45 = vor.u32 %v1271_v39, %v1270_v3  ;;  %v1144_v55 = vshrl.u32 %v1143_v19, 23 }
 0x166   :  { %v1540_v56 = vmin.u32 %v790_v33, %v2132_v1  ;;  %v2194_v11 = vshrl.u32 %v993_v61, 30  ;;  %v1275_v49 = vor.u32 %v1274_v51, %v1273_v18  ;;  %vm1279_vm2 = vcmp.lt.s32.totalorder %v1257_v60, 4 }
 0x167   :  { %vm1546_vm3 = vcmp.lt.s32.totalorder %v1545_v37, 0  ;;  %v1252_v54 = vor.u32 8388608, %v1251_v10  ;;  %vm1276_vm4 = vcmp.lt.s32.totalorder %v1257_v60, 1  ;;  %v1285_v43 = vsel %vm1279_vm2, %v1272_v45, 920167782 }
 0x168   :  { %v2196_v42 = vshrl.u32 %v1097_v59, 30  ;;  %vm1278_vm5 = vcmp.lt.s32.totalorder %v1257_v60, 3  ;;  %v1281_v0 = vsel %vm1279_vm2, %v1269_v26, 2102212464  ;;  %v1284_v63 = vsel %vm1276_vm4, %v1263_v57, %v1266_v27 }
 0x169   :  { %v1286_v50 = vsel %vm1278_vm5, %v1269_v26, %v1285_v43  ;;  %v1288_v19 = vsel %vm1276_vm4, %v1266_v27, %v1269_v26  ;;  %v1289_v3 = vsel %vm1279_vm2, %v1275_v49, 1326507024  ;;  %v1555_v33 = vadd.s32 4294967169, %v1144_v55 }
 0x16a   :  { %v792_v61 = vclz %v1540_v56  ;;  %v995_v39 = vshll.u32 %v2194_v11, 30  ;;  %v1260_v18 = vshrl.u32 %v2713_v52, %v1259_v17  ;;  %vm1277_vm6 = vcmp.lt.s32.totalorder %v1257_v60, 2 }
 0x16b   :  { %v697_v10 = vadd.s32 127, %v696_v47  ;;  %v1287_v59 = vsel %vm1277_vm6, %v1284_v63, %v1286_v50  ;;  %v1290_v51 = vsel %vm1278_vm5, %v1272_v45, %v1289_v3  ;;  %v1292_v16 = vshll.u32 %v1252_v54, 8 }
 0x16c   :  { %v2206_v62 = vsel %vm1546_vm3, 0, %v1545_v37  ;;  %v1280_v43 = vsel %vm1276_vm4, %v1260_v18, %v1263_v57  ;;  %v1282_v26 = vsel %vm1278_vm5, %v1266_v27, %v1281_v0  ;;  %v1291_v56 = vsel %vm1277_vm6, %v1288_v19, %v1290_v51 }
 0x16d   :  { %v1099_v55 = vshll.u32 %v2196_v42, 30  ;;  %v2212_v49 = vmul.u32.u64.low %v1292_v16, %v1291_v56  ;;  %v2213_v17 = vmul.u32.u64.high %v1292_v16, %v1291_v56, %v2212_v49  ;;  %v1150_v47 = vadd.s32 1, %v1555_v33 }
 0x16e   :  { %v1541_v30 = vadd.s32 4294967294, %v792_v61  ;;  %v2216_v50 = vsub.s32 %v2139_v36, %v995_v39  ;;  %v2218_v45 = vmul.u32.u64.low %v1292_v16, %v1287_v59  ;;  %v2219_v54 = vmul.u32.u64.high %v1292_v16, %v1287_v59, %v2218_v45 }
 0x16f   :  { %v698_v37 = vshll.u32 %v697_v10, 23  ;;  %v2226_v57 = vadd.s32 3, %v709_v29  ;;  %vm1151_vm7 = vcmp.gt.s32.totalorder %v1150_v47, 0  ;;  %v904_v36 = vsub.s32 4294967266, %v2206_v62 }
 0x170   :  { %v1283_v63 = vsel %vm1277_vm6, %v1280_v43, %v1282_v26  ;;  %v1152_v19 = vsel %vm1151_vm7, %v1150_v47, 0  ;;  %v2234_v3 = vshrl.u32 %v2157_v22, %v692_v35  ;;  %v2236_v33 = vsub.s32 %v1096_v7, %v1099_v55 }
 0x171   :  { %vm1301_vm9 = vc.u32 %v2213_v17, %v2218_v45  ;;  %v1154_v15 = vand.u32 31, %v1152_v19  ;;  %vm1542_vm10 = vcmp.lt.s32.totalorder %v1541_v30, 0  ;;  %v998_v29 = vsub.s32 0, %v2216_v50 }
 0x172   :  { %v1302_v61 = vadd.s32 1, %v2219_v54  ;;  %v2710_v39 = vand.u32 2147483647, %v2142_v12  ;;  %v2243_v18 = vor.u32 4788187, %v698_v37  ;;  %v2247_v60 = vadd.s32 %v1981_v20, %v1986_v25  ;;  %v504_v12 = vpop.f32.mrf.mxu1 }
 0x173   :  { %v1299_v22 = vmul.u32 %v1292_v16, %v1283_v63  ;;  %v1155_v7 = vsub.s32 32, %v1154_v15  ;;  %v900_v35 = vsub.s32 32, %v2206_v62  ;;  %v2252_v59 = vadd.s32 127, %v904_v36 }
 0x174   :  { %v1303_v51 = vsel %vm1301_vm9, %v1302_v61, %v2219_v54  ;;  %v2255_v43 = vsel %vm1542_vm10, 0, %v1541_v30  ;;  %v1102_v26 = vsub.s32 0, %v2236_v33  ;;  %v1548_v20 = vmin.u32 %v998_v29, %v2216_v50 }
 0x175   :  { %v1304_v56 = vadd.s32 %v1303_v51, %v1299_v22  ;;  %v1158_v55 = vshrl.u32 %v2711_v44, %v1155_v7  ;;  %v1147_v16 = vand.u32 8388607, %v2710_v39  ;;  %v1157_v25 = vshll.u32 %v2713_v52, %v1154_v15 }
 0x176   :  { %v1161_v49 = vshrl.u32 %v2720_v38, %v1155_v7  ;;  %v1160_v37 = vshll.u32 %v2711_v44, %v1154_v15  ;;  %v1164_v30 = vshrl.u32 %v2718_v40, %v1155_v7  ;;  %v1167_v54 = vshrl.u32 %v2722_v32, %v1155_v7 }
 0x177   :  { %v1305_v47 = vadd.s32 536870912, %v1304_v56  ;;  %v1153_v36 = vshrl.u32 %v1152_v19, 5  ;;  %v1163_v63 = vshll.u32 %v2720_v38, %v1154_v15  ;;  %v1166_v61 = vshll.u32 %v2718_v40, %v1154_v15 }
 0x178   :  { %v2733_v29 = vmov 1326507024   ;;  %v1552_v51 = vmin.u32 %v1102_v26, %v2236_v33  ;;  %v1159_v10 = vor.u32 %v1158_v55, %v1157_v25  ;;  %v1162_v27 = vor.u32 %v1161_v49, %v1160_v37 }
 0x179   :  { %v1170_v22 = vshrl.u32 %v2733_v29, %v1155_v7  ;;  %v2271_v39 = vshrl.u32 %v1305_v47, 30  ;;  %v902_v0 = vshrl.u32 %v2161_v4, %v900_v35  ;;  %v1165_v44 = vor.u32 %v1164_v30, %v1163_v63 }
 0x17a   :  { %v1168_v52 = vor.u32 %v1167_v54, %v1166_v61  ;;  %v1169_v6 = vshll.u32 %v2722_v32, %v1154_v15  ;;  %vm830_vm11 = vcmp.lt.s32.totalorder %v1795_v14, 0  ;;  %v906_v19 = vshll.u32 %v2252_v59, 23 }
 0x17b   :  { %2734 = vst [vmem:[#allocation15_spill] sm:$0xff] %v2271_v39  ;;  %v796_v40 = vsub.s32 32, %v2255_v43  ;;  %v800_v38 = vsub.s32 4294967266, %v2255_v43  ;;  %v1307_v26 = vshll.u32 %v2271_v39, 30  ;;  %v1000_v47 = vclz %v1548_v20 }
 0x17c   :  { %v1148_v55 = vor.u32 8388608, %v1147_v16  ;;  %v1171_v25 = vor.u32 %v1170_v22, %v1169_v6  ;;  %vm1172_vm12 = vcmp.lt.s32.totalorder %v1153_v36, 1  ;;  %v1104_v4 = vclz %v1552_v51 }
 0x17d   :  { %vm1175_vm13 = vcmp.lt.s32.totalorder %v1153_v36, 4  ;;  %v1180_v35 = vsel %vm1172_vm12, %v1159_v10, %v1162_v27  ;;  %v2282_v15 = vadd.f32 %v504_v12, %v2147_v8  ;;  %v2284_v49 = vsub.s32 %v1304_v56, %v1307_v26 }
 0x17e   :  { %vm1174_vm14 = vcmp.lt.s32.totalorder %v1153_v36, 3  ;;  %v1177_v59 = vsel %vm1175_vm13, %v1165_v44, 2102212464  ;;  %v1181_v37 = vsel %vm1175_vm13, %v1168_v52, 920167782  ;;  %vm1173_vm1 = vcmp.lt.s32.totalorder %v1153_v36, 2 }
 0x17f   :  { %v2735_v30 = vand.u32 2147483647, %v1795_v14  ;;  %v2738_v6 = vmov 683565275   ;;  %v1182_v16 = vsel %vm1174_vm14, %v1165_v44, %v1181_v37  ;;  %v1184_v63 = vsel %vm1172_vm12, %v1162_v27, %v1165_v44 }
 0x180   :  { %v1156_v20 = vshrl.u32 %v2738_v6, %v1155_v7  ;;  %v801_v61 = vadd.s32 127, %v800_v38  ;;  %v1183_v12 = vsel %vm1173_vm1, %v1180_v35, %v1182_v16  ;;  %v1185_v8 = vsel %vm1175_vm13, %v1171_v25, 1326507024 }
 0x181   :  { %vm2288_vm15 = vcmp.le.f32.partialorder %v2735_v30, 0.7853982  ;;  %v1188_v56 = vshll.u32 %v1148_v55, 8  ;;  %v1549_v22 = vadd.s32 4294967294, %v1000_v47  ;;  %v1178_v26 = vsel %vm1174_vm14, %v1162_v27, %v1177_v59 }
 0x182   :  { %v1176_v51 = vsel %vm1172_vm12, %v1156_v20, %v1159_v10  ;;  %v1186_v32 = vsel %vm1174_vm14, %v1168_v52, %v1185_v8  ;;  %v1310_v30 = vsub.s32 0, %v2284_v49  ;;  %v1553_v37 = vadd.s32 4294967294, %v1104_v4 }
 0x183   :  { %v1187_v58 = vsel %vm1173_vm1, %v1184_v63, %v1186_v32  ;;  %v2298_v39 = vmul.u32.u64.low %v1188_v56, %v1183_v12  ;;  %v2299_v7 = vmul.u32.u64.high %v1188_v56, %v1183_v12, %v2298_v39  ;;  %v1351_v25 = vand.u32 2139095040, %v2282_v15 }
 0x184   :  { %v2302_v44 = vmul.u32.u64.low %v1188_v56, %v1187_v58  ;;  %v2303_v38 = vmul.u32.u64.high %v1188_v56, %v1187_v58, %v2302_v44  ;;  %v2739_v47 = vshll.u32 %v1988_v31, %v2167_v9  ;;  %v2740_v52 = vsub.s32 4, %v1994_v46 }
 0x185   :  { %v802_v10 = vshll.u32 %v801_v61, 23  ;;  %v1179_v55 = vsel %vm1173_vm1, %v1176_v51, %v1178_v26  ;;  %v700_v4 = vand.u32 2147483647, %v2243_v18  ;;  %v2741_v58 = vshll.u32 %v2037_v48, %v2206_v62 }
 0x186   :  { %v695_v27 = vor.u32 %v2234_v3, %v2739_v47  ;;  %v915_v32 = vsel %vm830_vm11, %v2740_v52, %v1994_v46  ;;  %v798_v59 = vshrl.u32 %v2247_v60, %v796_v40  ;;  %v1352_v31 = vshrl.u32 %v1351_v25, 23 }
 0x187   :  { %v903_v35 = vor.u32 %v902_v0, %v2741_v58  ;;  %v907_v9 = vor.u32 4788187, %v906_v19  ;;  %vm1550_vm2 = vcmp.lt.s32.totalorder %v1549_v22, 0  ;;  %v1560_v3 = vmin.u32 %v1310_v30, %v2284_v49 }
 0x188   :  { %v1198_v20 = vadd.s32 1, %v2299_v7  ;;  %v797_v46 = vshll.u32 %v2132_v1, %v2255_v43  ;;  %vm1554_vm3 = vcmp.lt.s32.totalorder %v1553_v37, 0  ;;  %v1195_v36 = vmul.u32 %v1188_v56, %v1179_v55 }
 0x189   :  { %vm1197_vm4 = vc.u32 %v2303_v38, %v2298_v39  ;;  %v917_v62 = vsel %vm2288_vm15, 0, %v915_v32  ;;  %v803_v48 = vor.u32 4788187, %v802_v10  ;;  %v1563_v0 = vadd.s32 4294967169, %v1352_v31 }
 0x18a   :  { %v1199_v40 = vsel %vm1197_vm4, %v1198_v20, %v2299_v7  ;;  %v702_v18 = vcvt.s32.f32 %v695_v27  ;;  %v799_v60 = vor.u32 %v798_v59, %v797_v46  ;;  %v2330_v19 = vsel %vm1550_vm2, 0, %v1549_v22 }
 0x18b   :  { %v1200_v16 = vadd.s32 %v1199_v40, %v1195_v36  ;;  %v2332_v63 = vsel %vm1554_vm3, 0, %v1553_v37  ;;  %v1312_v1 = vclz %v1560_v3  ;;  %v1348_v43 = vand.u32 2147483647, %v2282_v15 }
 0x18c   :  { %v1358_v61 = vadd.s32 1, %v1563_v0  ;;  %v2335_v12 = vmul.f32 %v702_v18, %v700_v4  ;;  %v908_v8 = vand.u32 2147483647, %v907_v9  ;;  %v910_v56 = vcvt.s32.f32 %v903_v35 }
 0x18d   :  { %v1201_v51 = vadd.s32 536870912, %v1200_v16  ;;  %v804_v26 = vand.u32 2147483647, %v803_v48  ;;  %v988_v30 = vadd.s32 %v2079_v24, %v2087_v2  ;;  %v1004_v7 = vsub.s32 32, %v2330_v19 }
 0x18e   :  { %vm1359_vm5 = vcmp.gt.s32.totalorder %v1358_v61, 0  ;;  %v1008_v22 = vsub.s32 4294967266, %v2330_v19  ;;  %v1112_v37 = vsub.s32 4294967266, %v2332_v63  ;;  %v806_v47 = vcvt.s32.f32 %v799_v60 }
 0x18f   :  { %v2342_v44 = vshrl.u32 %v1201_v51, 30  ;;  %v1360_v25 = vsel %vm1359_vm5, %v1358_v61, 0  ;;  %v1561_v27 = vadd.s32 4294967294, %v1312_v1  ;;  %v1355_v52 = vand.u32 8388607, %v1348_v43 }
 0x190   :  { %v1362_v32 = vand.u32 31, %v1360_v25  ;;  %v704_v10 = vxor.u32 2147483648, %v2335_v12  ;;  %v2348_v24 = vand.u32 3, %v2226_v57  ;;  %v2350_v2 = vadd.s32 3, %v917_v62 }
 0x191   :  { %v1203_v55 = vshll.u32 %v2342_v44, 30  ;;  %v2353_v4 = vmul.f32 %v910_v56, %v908_v8  ;;  %v2355_v58 = vmul.f32 %v806_v47, %v804_v26  ;;  %v2357_v35 = vshrl.u32 %v988_v30, %v1004_v7 }
 0x192   :  { %v1363_v59 = vsub.s32 32, %v1362_v32  ;;  %v1009_v31 = vadd.s32 127, %v1008_v22  ;;  %v1092_v9 = vadd.s32 %v2134_v34, %v2129_v23  ;;  %v2361_v3 = vadd.s32 127, %v1112_v37 }
 0x193   :  { %v2363_v20 = vsub.s32 %v1200_v16, %v1203_v55  ;;  %vm1562_vm6 = vcmp.lt.s32.totalorder %v1561_v27, 0  ;;  %v1356_v57 = vor.u32 8388608, %v1355_v52  ;;  %v2742_v46 = vmov 2475754826  }
 0x194   :  { %v1366_v36 = vshrl.u32 %v2742_v46, %v1363_v59  ;;  %v2743_v62 = vmov 2131351028   ;;  %v1365_v0 = vshll.u32 %v2738_v6, %v1362_v32  ;;  %v1368_v18 = vshll.u32 %v2742_v46, %v1362_v32 }
 0x195   :  { %v1369_v48 = vshrl.u32 %v2743_v62, %v1363_v59  ;;  %v1206_v40 = vsub.s32 0, %v2363_v20  ;;  %v2744_v60 = vmov 2102212464   ;;  %v1361_v61 = vshrl.u32 %v1360_v25, 5 }
 0x196   :  { %v1372_v1 = vshrl.u32 %v2744_v60, %v1363_v59  ;;  %v1371_v23 = vshll.u32 %v2743_v62, %v1362_v32  ;;  %v1374_v34 = vshll.u32 %v2744_v60, %v1362_v32  ;;  %v2745_v16 = vmov 920167782  }
 0x197   :  { %v1375_v8 = vshrl.u32 %v2745_v16, %v1363_v59  ;;  %v2374_v56 = vsel %vm1562_vm6, 0, %v1561_v27  ;;  %v1556_v51 = vmin.u32 %v1206_v40, %v2363_v20  ;;  %v1367_v26 = vor.u32 %v1366_v36, %v1365_v0 }
 0x198   :  { %v1370_v30 = vor.u32 %v1369_v48, %v1368_v18  ;;  %v1373_v7 = vor.u32 %v1372_v1, %v1371_v23  ;;  %v1377_v37 = vshll.u32 %v2745_v16, %v1362_v32  ;;  %v1378_v47 = vshrl.u32 %v2733_v29, %v1363_v59 }
 0x199   :  { %v1376_v22 = vor.u32 %v1375_v8, %v1374_v34  ;;  %v1010_v52 = vshll.u32 %v1009_v31, 23  ;;  %v1108_v25 = vsub.s32 32, %v2332_v63  ;;  %v1114_v55 = vshll.u32 %v2361_v3, 23 }
 0x19a   :  { %v1208_v46 = vclz %v1556_v51  ;;  %v1320_v62 = vsub.s32 4294967266, %v2374_v56  ;;  %v1379_v27 = vor.u32 %v1378_v47, %v1377_v37  ;;  %vm1380_vm7 = vcmp.lt.s32.totalorder %v1361_v61, 1 }
 0x19b   :  { %v1396_v60 = vshll.u32 %v1356_v57, 8  ;;  %v1364_v36 = vshrl.u32 %v2738_v6, %v1363_v59  ;;  %vm1383_vm9 = vcmp.lt.s32.totalorder %v1361_v61, 4  ;;  %v1388_v48 = vsel %vm1380_vm7, %v1367_v26, %v1370_v30 }
 0x19c   :  { %v1557_v40 = vadd.s32 4294967294, %v1208_v46  ;;  %vm1382_vm10 = vcmp.lt.s32.totalorder %v1361_v61, 3  ;;  %v1385_v32 = vsel %vm1383_vm9, %v1373_v7, 2102212464  ;;  %v1389_v0 = vsel %vm1383_vm9, %v1376_v22, 920167782 }
 0x19d   :  { %v1392_v29 = vsel %vm1380_vm7, %v1370_v30, %v1373_v7  ;;  %vm1381_vm13 = vcmp.lt.s32.totalorder %v1361_v61, 2  ;;  %v1390_v31 = vsel %vm1382_vm10, %v1373_v7, %v1389_v0  ;;  %v1393_v18 = vsel %vm1383_vm9, %v1379_v27, 1326507024 }
 0x19e   :  { %vm1558_vm12 = vcmp.lt.s32.totalorder %v1557_v40, 0  ;;  %v1384_v1 = vsel %vm1380_vm7, %v1364_v36, %v1367_v26  ;;  %v1391_v23 = vsel %vm1381_vm13, %v1388_v48, %v1390_v31  ;;  %v1394_v34 = vsel %vm1382_vm10, %v1376_v22, %v1393_v18 }
 0x19f   :  { %v1211_v3 = vsel %vm1558_vm12, 0, %v1557_v40  ;;  %v1386_v8 = vsel %vm1382_vm10, %v1370_v30, %v1385_v32  ;;  %v1395_v6 = vsel %vm1381_vm13, %v1392_v29, %v1394_v34  ;;  %vm726_vm14 = vcmp.lt.s32.totalorder %v1803_v28, 0 }
 0x1a0   :  { %v1212_v16 = vsub.s32 32, %v1211_v3  ;;  %v1216_v57 = vsub.s32 4294967266, %v1211_v3  ;;  %v2386_v59 = vmul.u32.u64.low %v1396_v60, %v1395_v6  ;;  %v2387_v51 = vmul.u32.u64.high %v1396_v60, %v1395_v6, %v2386_v59 }
 0x1a1   :  { %v2389_v37 = vmul.u32.u64.low %v1396_v60, %v1391_v23  ;;  %v2390_v47 = vmul.u32.u64.high %v1396_v60, %v1391_v23, %v2389_v37  ;;  %v1005_v26 = vshll.u32 %v2216_v50, %v2330_v19  ;;  %v1011_v7 = vor.u32 4788187, %v1010_v52 }
 0x1a2   :  { %v1196_v22 = vadd.s32 %v2298_v39, %v2303_v38  ;;  %v1217_v46 = vadd.s32 127, %v1216_v57  ;;  %v808_v30 = vxor.u32 2147483648, %v2355_v58  ;;  %v1110_v27 = vshrl.u32 %v1092_v9, %v1108_v25 }
 0x1a3   :  { %v1321_v40 = vadd.s32 127, %v1320_v62  ;;  %v1387_v36 = vsel %vm1381_vm13, %v1384_v1, %v1386_v8  ;;  %v1007_v48 = vor.u32 %v2357_v35, %v1005_v26  ;;  %v1109_v32 = vshll.u32 %v2236_v33, %v2332_v63 }
 0x1a4   :  { %v1214_v0 = vshrl.u32 %v1196_v22, %v1212_v16  ;;  %v1218_v29 = vshll.u32 %v1217_v46, 23  ;;  %v2746_v50 = vand.u32 2147483647, %v1803_v28  ;;  %v1115_v39 = vor.u32 4788187, %v1114_v55 }
 0x1a5   :  { %v1316_v38 = vsub.s32 32, %v2374_v56  ;;  %vm1405_vm2 = vc.u32 %v2387_v51, %v2389_v37  ;;  %v1406_v9 = vadd.s32 1, %v2390_v47  ;;  %v1012_v35 = vand.u32 2147483647, %v1011_v7 }
 0x1a6   :  { %vm2404_vm1 = vcmp.le.f32.partialorder %v2746_v50, 0.7853982  ;;  %v1213_v61 = vshll.u32 %v2363_v20, %v1211_v3  ;;  %v1219_v33 = vor.u32 4788187, %v1218_v29  ;;  %v1403_v63 = vmul.u32 %v1396_v60, %v1387_v36  ;;  %v2752_v50 = vld [vmem:[#allocation15_spill] sm:$0xff] }
 0x1a7   :  { %v1111_v52 = vor.u32 %v1110_v27, %v1109_v32  ;;  %v1300_v25 = vadd.s32 %v2218_v45, %v2213_v17  ;;  %v1322_v62 = vshll.u32 %v1321_v40, 23  ;;  %v1407_v31 = vsel %vm1405_vm2, %v1406_v9, %v2390_v47 }
 0x1a8   :  { %v705_v55 = vsel %vm622_vm8, %v704_v10, %v2335_v12  ;;  %v810_v18 = vsub.s32 4, %v2095_v21  ;;  %v1215_v1 = vor.u32 %v1214_v0, %v1213_v61  ;;  %v1408_v23 = vadd.s32 %v1407_v31, %v1403_v63 }
 0x1a9   :  { %v912_v20 = vxor.u32 2147483648, %v2353_v4  ;;  %vm934_vm3 = vcmp.lt.s32.totalorder %v1877_v41, 0  ;;  %v1014_v60 = vcvt.s32.f32 %v1007_v48  ;;  %v1116_v3 = vand.u32 2147483647, %v1115_v39 }
 0x1aa   :  { %v1318_v17 = vshrl.u32 %v1300_v25, %v1316_v38  ;;  %v2425_v45 = vand.u32 3, %v2350_v2  ;;  %v809_v34 = vsel %vm726_vm14, %v808_v30, %v2355_v58  ;;  %v1220_v16 = vand.u32 2147483647, %v1219_v33 }
 0x1ab   :  { %v1409_v12 = vadd.s32 536870912, %v1408_v23  ;;  %v1015_v10 = vmul.f32 %v1014_v60, %v1012_v35  ;;  %v1118_v57 = vcvt.s32.f32 %v1111_v52  ;;  %v1317_v8 = vshll.u32 %v2284_v49, %v2374_v56 }
 0x1ac   :  { %v1323_v6 = vor.u32 4788187, %v1322_v62  ;;  %v708_v59 = vsel %vm2151_vm0, %v1793_v13, %v705_v55  ;;  %v2749_v47 = vand.u32 2147483647, %v1877_v41  ;;  %vm1038_vm4 = vcmp.lt.s32.totalorder %v2003_v53, 0  ;;  %v2757_v55 = vld [vmem:[#allocation14_spill] sm:$0xff] }
 0x1ad   :  { %v1222_v58 = vcvt.s32.f32 %v1215_v1  ;;  %v2442_v26 = vshrl.u32 %v1409_v12, 30  ;;  %v913_v49 = vsel %vm830_vm11, %v912_v20, %v2353_v4  ;;  %v811_v5 = vsel %vm726_vm14, %v810_v18, %v2095_v21 }
 0x1ae   :  { %vm2437_vm8 = vcmp.le.f32.partialorder %v2749_v47, 0.7853982  ;;  %v1119_v56 = vmul.f32 %v1118_v57, %v1116_v3  ;;  %v1319_v7 = vor.u32 %v1318_v17, %v1317_v8  ;;  %v812_v22 = vsel %vm2404_vm1, %v1803_v28, %v809_v34 }
 0x1af   :  { %v1018_v46 = vsub.s32 4, %v2194_v11  ;;  %v1223_v30 = vmul.f32 %v1222_v58, %v1220_v16  ;;  %v1411_v27 = vshll.u32 %v2442_v26, 30  ;;  %1613 = vcosq.f32 %v708_v59 }
 0x1b0   :  { %v1016_v40 = vxor.u32 2147483648, %v1015_v10  ;;  %v1122_v36 = vsub.s32 4, %v2196_v42  ;;  %v1324_v4 = vand.u32 2147483647, %v1323_v6  ;;  %1615 = vsinq.f32 %v708_v59 }
 0x1b1   :  { %v916_v21 = vsel %vm2288_vm15, %v1795_v14, %v913_v49  ;;  %v813_v48 = vsel %vm2404_vm1, 0, %v811_v5  ;;  %v2461_v32 = vsub.s32 %v1408_v23, %v1411_v27  ;;  %1617 = vcosq.f32 %v812_v22 }
 0x1b2   :  { %v1120_v0 = vxor.u32 2147483648, %v1119_v56  ;;  %v1326_v29 = vcvt.s32.f32 %v1319_v7  ;;  %v1330_v39 = vsub.s32 4, %v2752_v50  ;;  %1619 = vsinq.f32 %v812_v22 }
 0x1b3   :  { %v1019_v38 = vsel %vm934_vm3, %v1018_v46, %v2194_v11  ;;  %v1224_v9 = vxor.u32 2147483648, %v1223_v30  ;;  %v1414_v35 = vsub.s32 0, %v2461_v32  ;;  %v817_v54 = vadd.s32 3, %v813_v48  ;;  %v2756_v11 = vld [vmem:[#allocation13_spill] sm:$0xff] }
 0x1b4   :  { %v1017_v19 = vsel %vm934_vm3, %v1016_v40, %v1015_v10  ;;  %v1123_v61 = vsel %vm1038_vm4, %v1122_v36, %v2196_v42  ;;  %v1327_v33 = vmul.f32 %v1326_v29, %v1324_v4  ;;  %1621 = vcosq.f32 %v916_v21 }
 0x1b5   :  { %v2753_v63 = vand.u32 2147483647, %v2003_v53  ;;  %vm1246_vm11 = vcmp.lt.s32.totalorder %v2756_v11, 0  ;;  %v1564_v25 = vmin.u32 %v1414_v35, %v2461_v32  ;;  %v1021_v62 = vsel %vm2437_vm8, 0, %v1019_v38 }
 0x1b6   :  { %v1121_v31 = vsel %vm1038_vm4, %v1120_v0, %v1119_v56  ;;  %v1331_v42 = vsel %vm1246_vm11, %v1330_v39, %v2752_v50  ;;  %vm1142_vm15 = vcmp.lt.s32.totalorder %v2757_v55, 0  ;;  %v1020_v18 = vsel %vm2437_vm8, %v1877_v41, %v1017_v19 }
 0x1b7   :  { %vm2475_vm0 = vcmp.le.f32.partialorder %v2753_v63, 0.7853982  ;;  %v1225_v23 = vsel %vm1142_vm15, %v1224_v9, %v1223_v30  ;;  %v1416_v20 = vclz %v1564_v25  ;;  %1623 = vsinq.f32 %v916_v21 }
 0x1b8   :  { %v1125_v1 = vsel %vm2475_vm0, 0, %v1123_v61  ;;  %v2758_v60 = vand.u32 2147483647, %v2756_v11  ;;  %v1328_v17 = vxor.u32 2147483648, %v1327_v33  ;;  %v2761_v34 = vand.u32 2147483647, %v2757_v55 }
 0x1b9   :  { %v1025_v12 = vadd.s32 3, %v1021_v62  ;;  %v1124_v10 = vsel %vm2475_vm0, %v2003_v53, %v1121_v31  ;;  %v1565_v8 = vadd.s32 4294967294, %v1416_v20  ;;  %1625 = vcosq.f32 %v1020_v18 }
 0x1ba   :  { %vm2498_vm5 = vcmp.le.f32.partialorder %v2758_v60, 0.7853982  ;;  %vm2504_vm6 = vcmp.le.f32.partialorder %v2761_v34, 0.7853982  ;;  %v1129_v6 = vadd.s32 3, %v1125_v1  ;;  %v1226_v59 = vsub.s32 4, %v2342_v44 }
 0x1bb   :  { %v1333_v57 = vsel %vm2498_vm5, 0, %v1331_v42  ;;  %v1228_v47 = vsel %vm2504_vm6, %v2757_v55, %v1225_v23  ;;  %v2517_v2 = vand.u32 3, %v817_v54  ;;  %1627 = vsinq.f32 %v1020_v18 }
 0x1bc   :  { %vm1566_vm7 = vcmp.lt.s32.totalorder %v1565_v8, 0  ;;  %v2764_v58 = vlaneseq  ;;  %1629 = vcosq.f32 %v1124_v10  ;;  %v1329_v5 = vsel %vm1246_vm11, %v1328_v17, %v1327_v33  ;;  %v1614_v22 = vpop.eup %1613 }
 0x1bd   :  { %v1337_v56 = vadd.s32 3, %v1333_v57  ;;  %v1419_v7 = vsel %vm1566_vm7, 0, %v1565_v8  ;;  %1631 = vcosq.f32 %v1228_v47  ;;  %v1404_v46 = vadd.s32 %v2389_v37, %v2387_v51  ;;  %v1616_v40 = vpop.eup %1615 }
 0x1be   :  { %v2520_v49 = vand.u32 127, %v2764_v58  ;;  %v1420_v30 = vsub.s32 32, %v1419_v7  ;;  %v1424_v27 = vsub.s32 4294967266, %v1419_v7  ;;  %v2526_v36 = vand.u32 3, %v1025_v12  ;;  %v1618_v48 = vpop.eup %1617 }
 0x1bf   :  { %v2528_v4 = vand.u32 3, %v1129_v6  ;;  %v1227_v21 = vsel %vm1142_vm15, %v1226_v59, %v2342_v44  ;;  %1633 = vsinq.f32 %v1228_v47  ;;  %v1332_v0 = vsel %vm2498_vm5, %v2756_v11, %v1329_v5  ;;  %v1620_v50 = vpop.eup %1619 }
 0x1c0   :  { %v1421_v29 = vshll.u32 %v2461_v32, %v1419_v7  ;;  %v1422_v51 = vshrl.u32 %v1404_v46, %v1420_v30  ;;  %v1425_v37 = vadd.s32 127, %v1424_v27  ;;  %1635 = vsinq.f32 %v1124_v10 }
 0x1c1   :  { %v2537_v39 = vand.u32 3, %v1337_v56  ;;  %v2540_v38 = vadd.s32 128, %v2520_v49  ;;  %vm716_vm9 = vcmp.eq.s32.totalorder %v2348_v24, 0  ;;  %v2544_v35 = vadd.s32 256, %v2520_v49  ;;  %v2549_v32 = vpop.eup %1621 }
 0x1c2   :  { %v1423_v44 = vor.u32 %v1422_v51, %v1421_v29  ;;  %v1426_v9 = vshll.u32 %v1425_v37, 23  ;;  %v2547_v54 = vadd.s32 384, %v2520_v49  ;;  %1637 = vcosq.f32 %v1332_v0 }
 0x1c3   :  { %v1229_v19 = vsel %vm2504_vm6, 0, %v1227_v21  ;;  %vm1350_vm10 = vcmp.lt.s32.totalorder %v2282_v15, 0  ;;  %v2555_v61 = vadd.s32 512, %v2520_v49  ;;  %v2558_v33 = vadd.s32 640, %v2520_v49 }
 0x1c4   :  { %vm715_vm12 = vcmp.lt.s32.totalorder %v2348_v24, 2  ;;  %1639 = vsinq.f32 %v1332_v0  ;;  %vm2563_vm13 = vcmp.le.f32.partialorder %v1348_v43, 0.7853982  ;;  %v1427_v52 = vor.u32 4788187, %v1426_v9  ;;  %v1624_v23 = vpop.eup %1623 }
 0x1c5   :  { %v821_v25 = vxor.u32 2147483648, %v1620_v50  ;;  %v824_v62 = vxor.u32 2147483648, %v1618_v48  ;;  %v2568_v31 = vadd.s32 768, %v2520_v49  ;;  %v2571_v42 = vadd.s32 896, %v2520_v49 }
 0x1c6   :  { %v717_v18 = vxor.u32 2147483648, %v1616_v40  ;;  %v720_v1 = vxor.u32 2147483648, %v1614_v22  ;;  %vm816_vm14 = vweird.f32 %v1803_v28  ;;  %v1428_v20 = vand.u32 2147483647, %v1427_v52  ;;  %v1626_v16 = vpop.eup %1625 }
 0x1c7   :  { %v1430_v60 = vcvt.s32.f32 %v1423_v44  ;;  %v520_v43 = vand.u32 31, %v2520_v49  ;;  %v527_v3 = vand.u32 31, %v2540_v38  ;;  %v1233_v17 = vadd.s32 3, %v1229_v19 }
 0x1c8   :  { %v534_v34 = vand.u32 31, %v2544_v35  ;;  %vm820_vm1 = vcmp.eq.s32.totalorder %v2517_v2, 0  ;;  %vm823_vm2 = vcmp.eq.s32.totalorder %v2517_v2, 2  ;;  %vm719_vm3 = vcmp.eq.s32.totalorder %v2348_v24, 2  ;;  %v1628_v8 = vpop.eup %1627 }
 0x1c9   :  { %v1431_v12 = vmul.f32 %v1430_v60, %v1428_v20  ;;  %v822_v10 = vsel %vm820_vm1, %v1618_v48, %v821_v25  ;;  %v825_v57 = vsel %vm823_vm2, %v824_v62, %v1620_v50  ;;  %v1434_v6 = vsub.s32 4, %v2442_v26  ;;  %v1630_v49 = vpop.eup %1629 }
 0x1ca   :  { %v541_v59 = vand.u32 31, %v2547_v54  ;;  %v718_v47 = vsel %vm716_vm9, %v1614_v22, %v717_v18  ;;  %v721_v58 = vsel %vm719_vm3, %v720_v1, %v1616_v40  ;;  %v548_v56 = vand.u32 31, %v2555_v61  ;;  %v1632_v46 = vpop.eup %1631 }
 0x1cb   :  { %v1432_v5 = vxor.u32 2147483648, %v1431_v12  ;;  %v555_v7 = vand.u32 31, %v2558_v33  ;;  %vm819_vm8 = vcmp.lt.s32.totalorder %v2517_v2, 2  ;;  %v1234_v30 = vand.u32 3, %v1233_v17 }
 0x1cc   :  { %v562_v27 = vand.u32 31, %v2568_v31  ;;  %v826_v21 = vsel %vm819_vm8, %v822_v10, %v825_v57  ;;  %v925_v48 = vxor.u32 2147483648, %v1624_v23  ;;  %v1634_v0 = vpop.eup %1633  ;;  %v569_v22 = vand.u32 31, %v2571_v42 }
 0x1cd   :  { %v1433_v29 = vsel %vm1350_vm10, %v1432_v5, %v1431_v12  ;;  %v2593_v40 = vsel %vm715_vm12, %v718_v47, %v721_v58  ;;  %v928_v51 = vxor.u32 2147483648, %v2549_v32  ;;  %v1435_v2 = vsel %vm1350_vm10, %v1434_v6, %v2442_v26  ;;  %v1636_v44 = vpop.eup %1635 }
 0x1ce   :  { %v1436_v37 = vsel %vm2563_vm13, %v2282_v15, %v1433_v29  ;;  %vm923_vm4 = vcmp.lt.s32.totalorder %v2425_v45, 2  ;;  %v1029_v50 = vxor.u32 2147483648, %v1628_v8  ;;  %v1032_v38 = vxor.u32 2147483648, %v1626_v16 }
 0x1cf   :  { %1641 = vcosq.f32 %v1436_v37  ;;  %v2605_v24 = vsel %vm816_vm14, nan, %v826_v21  ;;  %vm924_vm0 = vcmp.eq.s32.totalorder %v2425_v45, 0  ;;  %vm927_vm11 = vcmp.eq.s32.totalorder %v2425_v45, 2  ;;  %v1638_v61 = vpop.eup %1637 }
 0x1d0   :  { %1643 = vsinq.f32 %v1436_v37  ;;  %vm2609_vm15 = vcmp.ge.s32.totalorder %v527_v3, 16  ;;  %vm2613_vm5 = vcmp.ge.s32.totalorder %v541_v59, 16  ;;  %v926_v35 = vsel %vm924_vm0, %v2549_v32, %v925_v48  ;;  %v2784_v37 = vld [vmem:[#allocation12_spill] sm:$0xff] }
 0x1d1   :  { %v1237_v54 = vxor.u32 2147483648, %v1634_v0  ;;  %v1240_v19 = vxor.u32 2147483648, %v1632_v46  ;;  %v1437_v33 = vsel %vm2563_vm13, 0, %v1435_v2  ;;  %vm712_vm6 = vweird.f32 %v1793_v13  ;;  %v1640_v25 = vpop.eup %1639 }
 0x1d2   :  { %v929_v52 = vsel %vm927_vm11, %v928_v51, %v1624_v23  ;;  %vm1028_vm9 = vcmp.eq.s32.totalorder %v2526_v36, 0  ;;  %vm1031_vm10 = vcmp.eq.s32.totalorder %v2526_v36, 2  ;;  %vm2624_vm12 = vcmp.ge.s32.totalorder %v520_v43, 16 }
 0x1d3   :  { %vm2628_vm14 = vcmp.ge.s32.totalorder %v534_v34, 16  ;;  %vm2632_vm1 = vcmp.ge.s32.totalorder %v555_v7, 16  ;;  %v1030_v31 = vsel %vm1028_vm9, %v1626_v16, %v1029_v50  ;;  %v1033_v18 = vsel %vm1031_vm10, %v1032_v38, %v1628_v8 }
 0x1d4   :  { %v1133_v1 = vxor.u32 2147483648, %v1636_v44  ;;  %v1136_v23 = vxor.u32 2147483648, %v1630_v49  ;;  %vm1027_vm13 = vcmp.lt.s32.totalorder %v2526_v36, 2  ;;  %vm1236_vm2 = vcmp.eq.s32.totalorder %v1234_v30, 0 }
 0x1d5   :  { %vm1239_vm3 = vcmp.eq.s32.totalorder %v1234_v30, 2  ;;  %v1441_v20 = vadd.s32 3, %v1437_v33  ;;  %vm2637_vm8 = vcmp.ge.s32.totalorder %v548_v56, 16  ;;  %vm1132_vm0 = vcmp.eq.s32.totalorder %v2528_v4, 0 }
 0x1d6   :  { %v1238_v43 = vsel %vm1236_vm2, %v1632_v46, %v1237_v54  ;;  %v1241_v3 = vsel %vm1239_vm3, %v1240_v19, %v1634_v0  ;;  %v1034_v17 = vsel %vm1027_vm13, %v1030_v31, %v1033_v18  ;;  %vm1135_vm11 = vcmp.eq.s32.totalorder %v2528_v4, 2 }
 0x1d7   :  { %v1341_v34 = vxor.u32 2147483648, %v1640_v25  ;;  %v1344_v16 = vxor.u32 2147483648, %v1638_v61  ;;  %v1134_v12 = vsel %vm1132_vm0, %v1630_v49, %v1133_v1  ;;  %v1137_v10 = vsel %vm1135_vm11, %v1136_v23, %v1636_v44 }
 0x1d8   :  { %vm1235_vm9 = vcmp.lt.s32.totalorder %v1234_v30, 2  ;;  %v1743_v36 = vmov 1966171168   ;;  %v930_v8 = vsel %vm923_vm4, %v926_v35, %v929_v52  ;;  %vm1024_vm10 = vweird.f32 %v1877_v41 }
 0x1d9   :  { %v1473_v57 = vunpack.c.l.s4 %v1743_v36  ;;  %vm1131_vm7 = vcmp.lt.s32.totalorder %v2528_v4, 2  ;;  %v1242_v6 = vsel %vm1235_vm9, %v1238_v43, %v1241_v3  ;;  %v1442_v59 = vand.u32 3, %v1441_v20 }
 0x1da   :  { %vm2647_vm2 = vcmp.ge.s32.totalorder %v562_v27, 16  ;;  %v1035_v58 = vsel %vm1024_vm10, nan, %v1034_v17  ;;  %vm1340_vm13 = vcmp.eq.s32.totalorder %v2537_v39, 0  ;;  %vm1343_vm3 = vcmp.eq.s32.totalorder %v2537_v39, 2 }
 0x1db   :  { %v1138_v49 = vsel %vm1131_vm7, %v1134_v12, %v1137_v10  ;;  %vm1232_vm0 = vweird.f32 %v2757_v55  ;;  %v1342_v45 = vsel %vm1340_vm13, %v1638_v61, %v1341_v34  ;;  %v1345_v5 = vsel %vm1343_vm3, %v1344_v16, %v1640_v25 }
 0x1dc   :  { %v723_v4 = vsel %vm712_vm6, nan, %v2593_v40  ;;  %vm2781_vm4 = vweird.f32 %v1795_v14  ;;  %v1243_v7 = vsel %vm1232_vm0, nan, %v1242_v6  ;;  %v1474_v46 = vunpack.c.0.s8 %v1473_v57  ;;  %v1642_v21 = vpop.eup %1641 }
 0x1dd   :  { %v931_v56 = vsel %vm2781_vm4, nan, %v930_v8  ;;  %vm1128_vm11 = vweird.f32 %v2003_v53  ;;  %vm1339_vm9 = vcmp.lt.s32.totalorder %v2537_v39, 2  ;;  %v1453_v30 = vsel %vm2609_vm15, %v2605_v24, %v1803_v28  ;;  %v1644_v39 = vpop.eup %1643 }
 0x1de   :  { %v1455_v27 = vsel %vm2613_vm5, %v1035_v58, %v1877_v41  ;;  %vm2670_vm6 = vcmp.ge.s32.totalorder %v569_v22, 16  ;;  %v1139_v0 = vsel %vm1128_vm11, nan, %v1138_v49  ;;  %v1346_v29 = vsel %vm1339_vm9, %v1342_v45, %v1345_v5 }
 0x1df   :  { %vm1447_vm7 = vcmp.eq.s32.totalorder %v1442_v59, 2  ;;  %v1448_v40 = vxor.u32 2147483648, %v1642_v21  ;;  %v1452_v28 = vsel %vm2624_vm12, %v723_v4, %v1793_v13  ;;  %v1454_v41 = vsel %vm2628_vm14, %v931_v56, %v1795_v14 }
 0x1e0   :  { %v1457_v42 = vsel %vm2632_vm1, %v1243_v7, %v2757_v55  ;;  %v1445_v22 = vxor.u32 2147483648, %v1644_v39  ;;  %v1468_v51 = vcombine.low %v1452_v28, %v1453_v30  ;;  %v1469_v2 = vcombine.low %v1454_v41, %v1455_v27 }
 0x1e1   :  { %v1477_v50 = vsub.s32 %v1474_v46, %v2784_v37  ;;  %vm1336_vm15 = vweird.f32 %v2756_v11  ;;  %vm1444_vm5 = vcmp.eq.s32.totalorder %v1442_v59, 0  ;;  %v1449_v38 = vsel %vm1447_vm7, %v1448_v40, %v1644_v39 }
 0x1e2   :  { %v1456_v13 = vsel %vm2637_vm8, %v1139_v0, %v2003_v53  ;;  %v1347_v44 = vsel %vm1336_vm15, nan, %v1346_v29  ;;  %vm1443_vm12 = vcmp.lt.s32.totalorder %v1442_v59, 2  ;;  %v1446_v14 = vsel %vm1444_vm5, %v1642_v21, %v1445_v22 }
 0x1e3   :  { %v1470_v24 = vcombine.low %v1456_v13, %v1457_v42  ;;  %vm1440_vm14 = vweird.f32 %v2282_v15  ;;  %v1450_v55 = vsel %vm1443_vm12, %v1446_v14, %v1449_v38  ;;  %v1478_v9 = vrot.slane %v1468_v51, %v1477_v50 }
 0x1e4   :  { %v1451_v26 = vsel %vm1440_vm14, nan, %v1450_v55  ;;  %v1485_v35 = vrot.slane %v1469_v2, %v1477_v50  ;;  %v1458_v54 = vsel %vm2647_vm2, %v1347_v44, %v2756_v11 }
 0x1e5   :  { %v1459_v19 = vsel %vm2670_vm6, %v1451_v26, %v2282_v15  ;;  %v1492_v53 = vrot.slane %v1470_v24, %v1477_v50 }
 0x1e6   :  { %v1471_v61 = vcombine.low %v1458_v54, %v1459_v19  ;;  %v1500_v52 = vcombine.low %v1478_v9, %v1485_v35 }
 0x1e8   :  { %v1499_v33 = vrot.slane %v1471_v61, %v1477_v50  ;;  %v1508_v62 = vrot.slane %v1500_v52, %v1477_v50 }
 0x1ea   :  { %v1501_v25 = vcombine.low %v1492_v53, %v1499_v33 }
 0x1ec   :  { %v1515_v32 = vrot.slane %v1501_v25, %v1477_v50 }
 0x1ee   :  { %v1516_v63 = vcombine.low %v1508_v62, %v1515_v32 }
 0x1f0   :  { %1518 = vst [vmem:[#allocation8] sm:$0xff] %v1516_v63 }
 0x1f1   :  { %1716 = shalt.err (!%p1713_p5)
}
 0x1f2   :  { %1528 = dma.vmem_to_hbm [thread:$0]  %s1526_s2, 128, %s2701_s3, [#allocation4]  }
 0x1f3   :  { %1729 = dma.done.wait [#allocation4], 128  }
 0x1f4   :  { %1730 = vsyncadd [#allocation4], 4294967168 }
 0x1f5   :  { %1532 = vsyncpa [#allocation3], 1 }
 0x1f6   :  { %1533 = vsyncpa [#allocation6], 1 }
 0x1f7   :  { %1534 = vsyncpa [#allocation4], 1 }

</bundles_post_ra>
